<compile_context>
chip_gen: v7x
topology: tpu7x:2x2x1
jax: 0.10.0
libtpu: 0.0.40
codegen_flags: <defaults>
</compile_context>

<pallas_src>
import jax
import jax.numpy as jnp
from jax.experimental import pallas as pl
from jax.experimental.pallas import tpu as pltpu

EMB_DIM = 64       # nn.Embedding(5, 64)
HIDDEN = 128       # nn.LSTM(input_size=64, hidden_size=128)
VOCAB = 5
VOCAB_PAD = 128    # pad vocab rows to a full lane width: clean layouts, ~free


def _lstm_classifier_kernel(tok_ref, table_ref, whh_ref, wcls_ref, bcls_ref,
                            out_ref):
    """Embedding gather + LSTM recurrence + classifier, one invocation.

    tok_ref   : (T, Bp, 1) int32   tokens (padded batch)
    table_ref : (Vp, 4H)   f32     emb @ W_ih^T + b  (gate order i,f,o,g;
                                   i/f/o columns pre-scaled by 0.5)
    whh_ref   : (H, 4H)    f32     W_hh^T, same reorder/pre-scale
    wcls_ref  : (1, H)     f32     classifier weight row
    bcls_ref  : (1, 1)     f32     classifier bias
    out_ref   : (Bp, 1)    f32     logits
    """
    T = tok_ref.shape[0]
    Bp = tok_ref.shape[1]
    Vp = table_ref.shape[0]
    H = whh_ref.shape[0]

    lane_ids = jax.lax.broadcasted_iota(jnp.int32, (Bp, Vp), 1)

    def step(t, carry):
        h, c = carry
        tok = tok_ref[t]                                    # (Bp, 1) int32
        onehot = jnp.where(tok == lane_ids, 1.0, 0.0)       # (Bp, Vp) f32
        xp = jnp.dot(onehot, table_ref[...],
                     preferred_element_type=jnp.float32)    # (Bp, 4H)
        gates = xp + jnp.dot(h, whh_ref[...],
                             preferred_element_type=jnp.float32)
        # i/f/o columns already carry the 0.5 pre-scale:
        # sigmoid(z) = 0.5 * (1 + tanh(0.5 z)) -> one tanh over (Bp, 3H).
        ifo = 0.5 * (1.0 + jnp.tanh(gates[:, 0:3 * H]))
        i_g = ifo[:, 0 * H:1 * H]
        f_g = ifo[:, 1 * H:2 * H]
        o_g = ifo[:, 2 * H:3 * H]
        g_g = jnp.tanh(gates[:, 3 * H:4 * H])
        c_new = f_g * c + i_g * g_g
        h_new = o_g * jnp.tanh(c_new)
        return (h_new, c_new)

    h0 = jnp.zeros((Bp, H), jnp.float32)
    c0 = jnp.zeros((Bp, H), jnp.float32)
    unroll = True if T <= 32 else 8
    h_last, _ = jax.lax.fori_loop(0, T, step, (h0, c0), unroll=unroll)

    # N=1 classifier: VPU multiply + lane reduction (skip the MXU tail).
    out_ref[...] = (jnp.sum(h_last * wcls_ref[...], axis=-1, keepdims=True)
                    + bcls_ref[...])


def preprocess_params(params):
    """One-time parameter preprocessing (reorder, pre-scale, fold, transpose)."""
    H = HIDDEN

    def reorder_ifog_to_ifog_last_g(w):
        # PyTorch gate order (i, f, g, o) -> (i, f, o, g) along the 4H axis.
        i, f, g, o = jnp.split(w, 4, axis=0)
        return jnp.concatenate([i, f, o, g], axis=0)

    w_ih = reorder_ifog_to_ifog_last_g(params["w_ih"].astype(jnp.float32))
    w_hh = reorder_ifog_to_ifog_last_g(params["w_hh"].astype(jnp.float32))
    b = reorder_ifog_to_ifog_last_g(
        (params["b_ih"] + params["b_hh"]).astype(jnp.float32))

    # Fold the 0.5 sigmoid pre-scale into the i/f/o rows.
    scale = jnp.concatenate(
        [jnp.full((3 * H,), 0.5, jnp.float32), jnp.ones((H,), jnp.float32)])
    w_ih = w_ih * scale[:, None]
    w_hh = w_hh * scale[:, None]
    b = b * scale

    # Vocab-padded projection table: rows >= VOCAB are never selected.
    emb_pad = jnp.zeros((VOCAB_PAD, EMB_DIM), jnp.float32)
    emb_pad = emb_pad.at[:VOCAB].set(params["emb"].astype(jnp.float32))
    table = emb_pad @ w_ih.T + b                          # (Vp, 4H)

    return {
        "table": table,
        "whh_t": w_hh.T,                                   # (H, 4H)
        "wcls": params["w_cls"].astype(jnp.float32).reshape(1, H),
        "bcls": params["b_cls"].astype(jnp.float32).reshape(1, 1),
    }


@jax.jit
def cpg_predictor_forward(tokens, prep):
    """tokens: (B, T) int32 in [0, 5). Returns logits (B, 1) float32."""
    B, T = tokens.shape
    B_pad = max(8, ((B + 7) // 8) * 8)

    tok = jnp.transpose(tokens.astype(jnp.int32))[:, :, None]   # (T, B, 1)
    if B_pad != B:
        # Padded rows read token 0; their state is garbage but sliced off.
        tok = jnp.pad(tok, ((0, 0), (0, B_pad - B), (0, 0)))

    out = pl.pallas_call(
        _lstm_classifier_kernel,
        out_shape=jax.ShapeDtypeStruct((B_pad, 1), jnp.float32),
        in_specs=[pl.BlockSpec(memory_space=pltpu.MemorySpace.VMEM)] * 5,
        out_specs=pl.BlockSpec(memory_space=pltpu.MemorySpace.VMEM),
    )(tok, prep["table"], prep["whh_t"], prep["wcls"], prep["bcls"])

    return out[:B]


def _reference_forward(tokens, params):
    """Pure-JAX reference matching torch semantics (gate order i,f,g,o)."""
    x = jnp.take(params["emb"], tokens, axis=0).astype(jnp.float32)  # (B,T,E)
    B = x.shape[0]
    wih, whh = params["w_ih"], params["w_hh"]
    b = params["b_ih"] + params["b_hh"]

    def step(carry, x_t):
        h, c = carry
        gates = x_t @ wih.T + h @ whh.T + b
        i, f, g, o = jnp.split(gates, 4, axis=-1)
        i, f, o = jax.nn.sigmoid(i), jax.nn.sigmoid(f), jax.nn.sigmoid(o)
        g = jnp.tanh(g)
        c = f * c + i * g
        h = o * jnp.tanh(c)
        return (h, c), None

    h0 = jnp.zeros((B, HIDDEN), jnp.float32)
    (h_last, _), _ = jax.lax.scan(step, (h0, h0), jnp.transpose(x, (1, 0, 2)))
    return h_last @ params["w_cls"].T + params["b_cls"]


def init_params(key):
    ks = jax.random.split(key, 7)
    bound = 1.0 / jnp.sqrt(HIDDEN)
    u = lambda k, shape, b: jax.random.uniform(k, shape, jnp.float32, -b, b)
    return {
        "emb": jax.random.normal(ks[0], (VOCAB, EMB_DIM), jnp.float32),
        "w_ih": u(ks[1], (4 * HIDDEN, EMB_DIM), bound),
        "w_hh": u(ks[2], (4 * HIDDEN, HIDDEN), bound),
        "b_ih": u(ks[3], (4 * HIDDEN,), bound),
        "b_hh": u(ks[4], (4 * HIDDEN,), bound),
        "w_cls": u(ks[5], (1, HIDDEN), bound),
        "b_cls": u(ks[6], (1,), bound),
    }


if __name__ == "__main__":
    key = jax.random.PRNGKey(0)
    pkey, tkey = jax.random.split(key)
    params = init_params(pkey)
    prep = jax.tree_util.tree_map(jax.block_until_ready,
                                  preprocess_params(params))

    B, T = 4, 8
    tokens = jax.random.randint(tkey, (B, T), 0, VOCAB, dtype=jnp.int32)

    logits = cpg_predictor_forward(tokens, prep)
    logits = jax.block_until_ready(logits)

    ref = _reference_forward(tokens, params)
    assert logits.shape == (B, 1)
    assert jnp.allclose(logits, ref, atol=1e-4, rtol=1e-4), (logits, ref)

    print("KERNEL_OK")
</pallas_src>

<mosaic_0001>
module attributes {stable_mosaic.version = 11 : i64} {
  func.func @_lstm_classifier_kernel(%arg0: memref<8x8x1xi32, #tpu.memory_space<vmem>>, %arg1: memref<128x512xf32, #tpu.memory_space<vmem>>, %arg2: memref<128x512xf32, #tpu.memory_space<vmem>>, %arg3: memref<1x128xf32, #tpu.memory_space<vmem>>, %arg4: memref<1x1xf32, #tpu.memory_space<vmem>>, %arg5: memref<8x1xf32, #tpu.memory_space<vmem>>) attributes {dimension_semantics = [], scalar_prefetch = 0 : i64, scratch_operands = 0 : i64, tpu.core_type = #tpu.core_type<tc>} {
    %0 = tpu.iota {dimensions = array<i32: 1>} : vector<8x128xi32>
    %cst = arith.constant 0.000000e+00 : f32
    %1 = vector.broadcast %cst : f32 to vector<8x128xf32>
    %cst_0 = arith.constant 0.000000e+00 : f32
    %2 = vector.broadcast %cst_0 : f32 to vector<8x128xf32>
    %c0_i32 = arith.constant 0 : i32
    %3 = arith.index_cast %c0_i32 : i32 to index
    %c0 = arith.constant 0 : index
    %c0_1 = arith.constant 0 : index
    %4 = vector.load %arg0[%3, %c0, %c0_1] : memref<8x8x1xi32, #tpu.memory_space<vmem>>, vector<1x8x1xi32>
    %5 = vector.shape_cast %4 : vector<1x8x1xi32> to vector<8x1xi32>
    %6 = vector.broadcast %5 : vector<8x1xi32> to vector<8x128xi32>
    %7 = arith.cmpi eq, %6, %0 : vector<8x128xi32>
    %cst_2 = arith.constant 1.000000e+00 : f32
    %cst_3 = arith.constant 0.000000e+00 : f32
    %8 = vector.broadcast %cst_2 : f32 to vector<8x128xf32>
    %9 = vector.broadcast %cst_3 : f32 to vector<8x128xf32>
    %10 = arith.select %7, %8, %9 : vector<8x128xi1>, vector<8x128xf32>
    %c0_4 = arith.constant 0 : index
    %c0_5 = arith.constant 0 : index
    %11 = vector.load %arg1[%c0_4, %c0_5] : memref<128x512xf32, #tpu.memory_space<vmem>>, vector<128x512xf32>
    %cst_6 = arith.constant dense<0.000000e+00> : vector<8x512xf32>
    %12 = tpu.matmul %10, %11, %cst_6 {dimension_numbers = #tpu.dot_dimension_numbers<[1], [0], [0], [1], [0, 0, 1, 1], [], []>} : vector<8x128xf32>, vector<128x512xf32>, vector<8x512xf32> -> vector<8x512xf32>
    %c0_7 = arith.constant 0 : index
    %c0_8 = arith.constant 0 : index
    %13 = vector.load %arg2[%c0_7, %c0_8] : memref<128x512xf32, #tpu.memory_space<vmem>>, vector<128x512xf32>
    %cst_9 = arith.constant dense<0.000000e+00> : vector<8x512xf32>
    %14 = tpu.matmul %1, %13, %cst_9 {dimension_numbers = #tpu.dot_dimension_numbers<[1], [0], [0], [1], [0, 0, 1, 1], [], []>} : vector<8x128xf32>, vector<128x512xf32>, vector<8x512xf32> -> vector<8x512xf32>
    %15 = arith.addf %12, %14 : vector<8x512xf32>
    %16 = vector.extract_strided_slice %15 {offsets = [0, 0], sizes = [8, 384], strides = [1, 1]} : vector<8x512xf32> to vector<8x384xf32>
    %17 = math.tanh %16 : vector<8x384xf32>
    %cst_10 = arith.constant 1.000000e+00 : f32
    %18 = vector.broadcast %cst_10 : f32 to vector<8x384xf32>
    %19 = arith.addf %18, %17 : vector<8x384xf32>
    %cst_11 = arith.constant 5.000000e-01 : f32
    %20 = vector.broadcast %cst_11 : f32 to vector<8x384xf32>
    %21 = arith.mulf %20, %19 : vector<8x384xf32>
    %22 = vector.extract_strided_slice %21 {offsets = [0, 0], sizes = [8, 128], strides = [1, 1]} : vector<8x384xf32> to vector<8x128xf32>
    %23 = vector.extract_strided_slice %21 {offsets = [0, 128], sizes = [8, 128], strides = [1, 1]} : vector<8x384xf32> to vector<8x128xf32>
    %24 = vector.extract_strided_slice %21 {offsets = [0, 256], sizes = [8, 128], strides = [1, 1]} : vector<8x384xf32> to vector<8x128xf32>
    %25 = vector.extract_strided_slice %15 {offsets = [0, 384], sizes = [8, 128], strides = [1, 1]} : vector<8x512xf32> to vector<8x128xf32>
    %26 = math.tanh %25 : vector<8x128xf32>
    %27 = arith.mulf %23, %2 : vector<8x128xf32>
    %28 = arith.mulf %22, %26 : vector<8x128xf32>
    %29 = arith.addf %27, %28 : vector<8x128xf32>
    %30 = math.tanh %29 : vector<8x128xf32>
    %31 = arith.mulf %24, %30 : vector<8x128xf32>
    %c1_i32 = arith.constant 1 : i32
    %32 = arith.index_cast %c1_i32 : i32 to index
    %c0_12 = arith.constant 0 : index
    %c0_13 = arith.constant 0 : index
    %33 = vector.load %arg0[%32, %c0_12, %c0_13] : memref<8x8x1xi32, #tpu.memory_space<vmem>>, vector<1x8x1xi32>
    %34 = vector.shape_cast %33 : vector<1x8x1xi32> to vector<8x1xi32>
    %35 = vector.broadcast %34 : vector<8x1xi32> to vector<8x128xi32>
    %36 = arith.cmpi eq, %35, %0 : vector<8x128xi32>
    %cst_14 = arith.constant 1.000000e+00 : f32
    %cst_15 = arith.constant 0.000000e+00 : f32
    %37 = vector.broadcast %cst_14 : f32 to vector<8x128xf32>
    %38 = vector.broadcast %cst_15 : f32 to vector<8x128xf32>
    %39 = arith.select %36, %37, %38 : vector<8x128xi1>, vector<8x128xf32>
    %c0_16 = arith.constant 0 : index
    %c0_17 = arith.constant 0 : index
    %40 = vector.load %arg1[%c0_16, %c0_17] : memref<128x512xf32, #tpu.memory_space<vmem>>, vector<128x512xf32>
    %cst_18 = arith.constant dense<0.000000e+00> : vector<8x512xf32>
    %41 = tpu.matmul %39, %40, %cst_18 {dimension_numbers = #tpu.dot_dimension_numbers<[1], [0], [0], [1], [0, 0, 1, 1], [], []>} : vector<8x128xf32>, vector<128x512xf32>, vector<8x512xf32> -> vector<8x512xf32>
    %c0_19 = arith.constant 0 : index
    %c0_20 = arith.constant 0 : index
    %42 = vector.load %arg2[%c0_19, %c0_20] : memref<128x512xf32, #tpu.memory_space<vmem>>, vector<128x512xf32>
    %cst_21 = arith.constant dense<0.000000e+00> : vector<8x512xf32>
    %43 = tpu.matmul %31, %42, %cst_21 {dimension_numbers = #tpu.dot_dimension_numbers<[1], [0], [0], [1], [0, 0, 1, 1], [], []>} : vector<8x128xf32>, vector<128x512xf32>, vector<8x512xf32> -> vector<8x512xf32>
    %44 = arith.addf %41, %43 : vector<8x512xf32>
    %45 = vector.extract_strided_slice %44 {offsets = [0, 0], sizes = [8, 384], strides = [1, 1]} : vector<8x512xf32> to vector<8x384xf32>
    %46 = math.tanh %45 : vector<8x384xf32>
    %cst_22 = arith.constant 1.000000e+00 : f32
    %47 = vector.broadcast %cst_22 : f32 to vector<8x384xf32>
    %48 = arith.addf %47, %46 : vector<8x384xf32>
    %cst_23 = arith.constant 5.000000e-01 : f32
    %49 = vector.broadcast %cst_23 : f32 to vector<8x384xf32>
    %50 = arith.mulf %49, %48 : vector<8x384xf32>
    %51 = vector.extract_strided_slice %50 {offsets = [0, 0], sizes = [8, 128], strides = [1, 1]} : vector<8x384xf32> to vector<8x128xf32>
    %52 = vector.extract_strided_slice %50 {offsets = [0, 128], sizes = [8, 128], strides = [1, 1]} : vector<8x384xf32> to vector<8x128xf32>
    %53 = vector.extract_strided_slice %50 {offsets = [0, 256], sizes = [8, 128], strides = [1, 1]} : vector<8x384xf32> to vector<8x128xf32>
    %54 = vector.extract_strided_slice %44 {offsets = [0, 384], sizes = [8, 128], strides = [1, 1]} : vector<8x512xf32> to vector<8x128xf32>
    %55 = math.tanh %54 : vector<8x128xf32>
    %56 = arith.mulf %52, %29 : vector<8x128xf32>
    %57 = arith.mulf %51, %55 : vector<8x128xf32>
    %58 = arith.addf %56, %57 : vector<8x128xf32>
    %59 = math.tanh %58 : vector<8x128xf32>
    %60 = arith.mulf %53, %59 : vector<8x128xf32>
    %c2_i32 = arith.constant 2 : i32
    %61 = arith.index_cast %c2_i32 : i32 to index
    %c0_24 = arith.constant 0 : index
    %c0_25 = arith.constant 0 : index
    %62 = vector.load %arg0[%61, %c0_24, %c0_25] : memref<8x8x1xi32, #tpu.memory_space<vmem>>, vector<1x8x1xi32>
    %63 = vector.shape_cast %62 : vector<1x8x1xi32> to vector<8x1xi32>
    %64 = vector.broadcast %63 : vector<8x1xi32> to vector<8x128xi32>
    %65 = arith.cmpi eq, %64, %0 : vector<8x128xi32>
    %cst_26 = arith.constant 1.000000e+00 : f32
    %cst_27 = arith.constant 0.000000e+00 : f32
    %66 = vector.broadcast %cst_26 : f32 to vector<8x128xf32>
    %67 = vector.broadcast %cst_27 : f32 to vector<8x128xf32>
    %68 = arith.select %65, %66, %67 : vector<8x128xi1>, vector<8x128xf32>
    %c0_28 = arith.constant 0 : index
    %c0_29 = arith.constant 0 : index
    %69 = vector.load %arg1[%c0_28, %c0_29] : memref<128x512xf32, #tpu.memory_space<vmem>>, vector<128x512xf32>
    %cst_30 = arith.constant dense<0.000000e+00> : vector<8x512xf32>
    %70 = tpu.matmul %68, %69, %cst_30 {dimension_numbers = #tpu.dot_dimension_numbers<[1], [0], [0], [1], [0, 0, 1, 1], [], []>} : vector<8x128xf32>, vector<128x512xf32>, vector<8x512xf32> -> vector<8x512xf32>
    %c0_31 = arith.constant 0 : index
    %c0_32 = arith.constant 0 : index
    %71 = vector.load %arg2[%c0_31, %c0_32] : memref<128x512xf32, #tpu.memory_space<vmem>>, vector<128x512xf32>
    %cst_33 = arith.constant dense<0.000000e+00> : vector<8x512xf32>
    %72 = tpu.matmul %60, %71, %cst_33 {dimension_numbers = #tpu.dot_dimension_numbers<[1], [0], [0], [1], [0, 0, 1, 1], [], []>} : vector<8x128xf32>, vector<128x512xf32>, vector<8x512xf32> -> vector<8x512xf32>
    %73 = arith.addf %70, %72 : vector<8x512xf32>
    %74 = vector.extract_strided_slice %73 {offsets = [0, 0], sizes = [8, 384], strides = [1, 1]} : vector<8x512xf32> to vector<8x384xf32>
    %75 = math.tanh %74 : vector<8x384xf32>
    %cst_34 = arith.constant 1.000000e+00 : f32
    %76 = vector.broadcast %cst_34 : f32 to vector<8x384xf32>
    %77 = arith.addf %76, %75 : vector<8x384xf32>
    %cst_35 = arith.constant 5.000000e-01 : f32
    %78 = vector.broadcast %cst_35 : f32 to vector<8x384xf32>
    %79 = arith.mulf %78, %77 : vector<8x384xf32>
    %80 = vector.extract_strided_slice %79 {offsets = [0, 0], sizes = [8, 128], strides = [1, 1]} : vector<8x384xf32> to vector<8x128xf32>
    %81 = vector.extract_strided_slice %79 {offsets = [0, 128], sizes = [8, 128], strides = [1, 1]} : vector<8x384xf32> to vector<8x128xf32>
    %82 = vector.extract_strided_slice %79 {offsets = [0, 256], sizes = [8, 128], strides = [1, 1]} : vector<8x384xf32> to vector<8x128xf32>
    %83 = vector.extract_strided_slice %73 {offsets = [0, 384], sizes = [8, 128], strides = [1, 1]} : vector<8x512xf32> to vector<8x128xf32>
    %84 = math.tanh %83 : vector<8x128xf32>
    %85 = arith.mulf %81, %58 : vector<8x128xf32>
    %86 = arith.mulf %80, %84 : vector<8x128xf32>
    %87 = arith.addf %85, %86 : vector<8x128xf32>
    %88 = math.tanh %87 : vector<8x128xf32>
    %89 = arith.mulf %82, %88 : vector<8x128xf32>
    %c3_i32 = arith.constant 3 : i32
    %90 = arith.index_cast %c3_i32 : i32 to index
    %c0_36 = arith.constant 0 : index
    %c0_37 = arith.constant 0 : index
    %91 = vector.load %arg0[%90, %c0_36, %c0_37] : memref<8x8x1xi32, #tpu.memory_space<vmem>>, vector<1x8x1xi32>
    %92 = vector.shape_cast %91 : vector<1x8x1xi32> to vector<8x1xi32>
    %93 = vector.broadcast %92 : vector<8x1xi32> to vector<8x128xi32>
    %94 = arith.cmpi eq, %93, %0 : vector<8x128xi32>
    %cst_38 = arith.constant 1.000000e+00 : f32
    %cst_39 = arith.constant 0.000000e+00 : f32
    %95 = vector.broadcast %cst_38 : f32 to vector<8x128xf32>
    %96 = vector.broadcast %cst_39 : f32 to vector<8x128xf32>
    %97 = arith.select %94, %95, %96 : vector<8x128xi1>, vector<8x128xf32>
    %c0_40 = arith.constant 0 : index
    %c0_41 = arith.constant 0 : index
    %98 = vector.load %arg1[%c0_40, %c0_41] : memref<128x512xf32, #tpu.memory_space<vmem>>, vector<128x512xf32>
    %cst_42 = arith.constant dense<0.000000e+00> : vector<8x512xf32>
    %99 = tpu.matmul %97, %98, %cst_42 {dimension_numbers = #tpu.dot_dimension_numbers<[1], [0], [0], [1], [0, 0, 1, 1], [], []>} : vector<8x128xf32>, vector<128x512xf32>, vector<8x512xf32> -> vector<8x512xf32>
    %c0_43 = arith.constant 0 : index
    %c0_44 = arith.constant 0 : index
    %100 = vector.load %arg2[%c0_43, %c0_44] : memref<128x512xf32, #tpu.memory_space<vmem>>, vector<128x512xf32>
    %cst_45 = arith.constant dense<0.000000e+00> : vector<8x512xf32>
    %101 = tpu.matmul %89, %100, %cst_45 {dimension_numbers = #tpu.dot_dimension_numbers<[1], [0], [0], [1], [0, 0, 1, 1], [], []>} : vector<8x128xf32>, vector<128x512xf32>, vector<8x512xf32> -> vector<8x512xf32>
    %102 = arith.addf %99, %101 : vector<8x512xf32>
    %103 = vector.extract_strided_slice %102 {offsets = [0, 0], sizes = [8, 384], strides = [1, 1]} : vector<8x512xf32> to vector<8x384xf32>
    %104 = math.tanh %103 : vector<8x384xf32>
    %cst_46 = arith.constant 1.000000e+00 : f32
    %105 = vector.broadcast %cst_46 : f32 to vector<8x384xf32>
    %106 = arith.addf %105, %104 : vector<8x384xf32>
    %cst_47 = arith.constant 5.000000e-01 : f32
    %107 = vector.broadcast %cst_47 : f32 to vector<8x384xf32>
    %108 = arith.mulf %107, %106 : vector<8x384xf32>
    %109 = vector.extract_strided_slice %108 {offsets = [0, 0], sizes = [8, 128], strides = [1, 1]} : vector<8x384xf32> to vector<8x128xf32>
    %110 = vector.extract_strided_slice %108 {offsets = [0, 128], sizes = [8, 128], strides = [1, 1]} : vector<8x384xf32> to vector<8x128xf32>
    %111 = vector.extract_strided_slice %108 {offsets = [0, 256], sizes = [8, 128], strides = [1, 1]} : vector<8x384xf32> to vector<8x128xf32>
    %112 = vector.extract_strided_slice %102 {offsets = [0, 384], sizes = [8, 128], strides = [1, 1]} : vector<8x512xf32> to vector<8x128xf32>
    %113 = math.tanh %112 : vector<8x128xf32>
    %114 = arith.mulf %110, %87 : vector<8x128xf32>
    %115 = arith.mulf %109, %113 : vector<8x128xf32>
    %116 = arith.addf %114, %115 : vector<8x128xf32>
    %117 = math.tanh %116 : vector<8x128xf32>
    %118 = arith.mulf %111, %117 : vector<8x128xf32>
    %c4_i32 = arith.constant 4 : i32
    %119 = arith.index_cast %c4_i32 : i32 to index
    %c0_48 = arith.constant 0 : index
    %c0_49 = arith.constant 0 : index
    %120 = vector.load %arg0[%119, %c0_48, %c0_49] : memref<8x8x1xi32, #tpu.memory_space<vmem>>, vector<1x8x1xi32>
    %121 = vector.shape_cast %120 : vector<1x8x1xi32> to vector<8x1xi32>
    %122 = vector.broadcast %121 : vector<8x1xi32> to vector<8x128xi32>
    %123 = arith.cmpi eq, %122, %0 : vector<8x128xi32>
    %cst_50 = arith.constant 1.000000e+00 : f32
    %cst_51 = arith.constant 0.000000e+00 : f32
    %124 = vector.broadcast %cst_50 : f32 to vector<8x128xf32>
    %125 = vector.broadcast %cst_51 : f32 to vector<8x128xf32>
    %126 = arith.select %123, %124, %125 : vector<8x128xi1>, vector<8x128xf32>
    %c0_52 = arith.constant 0 : index
    %c0_53 = arith.constant 0 : index
    %127 = vector.load %arg1[%c0_52, %c0_53] : memref<128x512xf32, #tpu.memory_space<vmem>>, vector<128x512xf32>
    %cst_54 = arith.constant dense<0.000000e+00> : vector<8x512xf32>
    %128 = tpu.matmul %126, %127, %cst_54 {dimension_numbers = #tpu.dot_dimension_numbers<[1], [0], [0], [1], [0, 0, 1, 1], [], []>} : vector<8x128xf32>, vector<128x512xf32>, vector<8x512xf32> -> vector<8x512xf32>
    %c0_55 = arith.constant 0 : index
    %c0_56 = arith.constant 0 : index
    %129 = vector.load %arg2[%c0_55, %c0_56] : memref<128x512xf32, #tpu.memory_space<vmem>>, vector<128x512xf32>
    %cst_57 = arith.constant dense<0.000000e+00> : vector<8x512xf32>
    %130 = tpu.matmul %118, %129, %cst_57 {dimension_numbers = #tpu.dot_dimension_numbers<[1], [0], [0], [1], [0, 0, 1, 1], [], []>} : vector<8x128xf32>, vector<128x512xf32>, vector<8x512xf32> -> vector<8x512xf32>
    %131 = arith.addf %128, %130 : vector<8x512xf32>
    %132 = vector.extract_strided_slice %131 {offsets = [0, 0], sizes = [8, 384], strides = [1, 1]} : vector<8x512xf32> to vector<8x384xf32>
    %133 = math.tanh %132 : vector<8x384xf32>
    %cst_58 = arith.constant 1.000000e+00 : f32
    %134 = vector.broadcast %cst_58 : f32 to vector<8x384xf32>
    %135 = arith.addf %134, %133 : vector<8x384xf32>
    %cst_59 = arith.constant 5.000000e-01 : f32
    %136 = vector.broadcast %cst_59 : f32 to vector<8x384xf32>
    %137 = arith.mulf %136, %135 : vector<8x384xf32>
    %138 = vector.extract_strided_slice %137 {offsets = [0, 0], sizes = [8, 128], strides = [1, 1]} : vector<8x384xf32> to vector<8x128xf32>
    %139 = vector.extract_strided_slice %137 {offsets = [0, 128], sizes = [8, 128], strides = [1, 1]} : vector<8x384xf32> to vector<8x128xf32>
    %140 = vector.extract_strided_slice %137 {offsets = [0, 256], sizes = [8, 128], strides = [1, 1]} : vector<8x384xf32> to vector<8x128xf32>
    %141 = vector.extract_strided_slice %131 {offsets = [0, 384], sizes = [8, 128], strides = [1, 1]} : vector<8x512xf32> to vector<8x128xf32>
    %142 = math.tanh %141 : vector<8x128xf32>
    %143 = arith.mulf %139, %116 : vector<8x128xf32>
    %144 = arith.mulf %138, %142 : vector<8x128xf32>
    %145 = arith.addf %143, %144 : vector<8x128xf32>
    %146 = math.tanh %145 : vector<8x128xf32>
    %147 = arith.mulf %140, %146 : vector<8x128xf32>
    %c5_i32 = arith.constant 5 : i32
    %148 = arith.index_cast %c5_i32 : i32 to index
    %c0_60 = arith.constant 0 : index
    %c0_61 = arith.constant 0 : index
    %149 = vector.load %arg0[%148, %c0_60, %c0_61] : memref<8x8x1xi32, #tpu.memory_space<vmem>>, vector<1x8x1xi32>
    %150 = vector.shape_cast %149 : vector<1x8x1xi32> to vector<8x1xi32>
    %151 = vector.broadcast %150 : vector<8x1xi32> to vector<8x128xi32>
    %152 = arith.cmpi eq, %151, %0 : vector<8x128xi32>
    %cst_62 = arith.constant 1.000000e+00 : f32
    %cst_63 = arith.constant 0.000000e+00 : f32
    %153 = vector.broadcast %cst_62 : f32 to vector<8x128xf32>
    %154 = vector.broadcast %cst_63 : f32 to vector<8x128xf32>
    %155 = arith.select %152, %153, %154 : vector<8x128xi1>, vector<8x128xf32>
    %c0_64 = arith.constant 0 : index
    %c0_65 = arith.constant 0 : index
    %156 = vector.load %arg1[%c0_64, %c0_65] : memref<128x512xf32, #tpu.memory_space<vmem>>, vector<128x512xf32>
    %cst_66 = arith.constant dense<0.000000e+00> : vector<8x512xf32>
    %157 = tpu.matmul %155, %156, %cst_66 {dimension_numbers = #tpu.dot_dimension_numbers<[1], [0], [0], [1], [0, 0, 1, 1], [], []>} : vector<8x128xf32>, vector<128x512xf32>, vector<8x512xf32> -> vector<8x512xf32>
    %c0_67 = arith.constant 0 : index
    %c0_68 = arith.constant 0 : index
    %158 = vector.load %arg2[%c0_67, %c0_68] : memref<128x512xf32, #tpu.memory_space<vmem>>, vector<128x512xf32>
    %cst_69 = arith.constant dense<0.000000e+00> : vector<8x512xf32>
    %159 = tpu.matmul %147, %158, %cst_69 {dimension_numbers = #tpu.dot_dimension_numbers<[1], [0], [0], [1], [0, 0, 1, 1], [], []>} : vector<8x128xf32>, vector<128x512xf32>, vector<8x512xf32> -> vector<8x512xf32>
    %160 = arith.addf %157, %159 : vector<8x512xf32>
    %161 = vector.extract_strided_slice %160 {offsets = [0, 0], sizes = [8, 384], strides = [1, 1]} : vector<8x512xf32> to vector<8x384xf32>
    %162 = math.tanh %161 : vector<8x384xf32>
    %cst_70 = arith.constant 1.000000e+00 : f32
    %163 = vector.broadcast %cst_70 : f32 to vector<8x384xf32>
    %164 = arith.addf %163, %162 : vector<8x384xf32>
    %cst_71 = arith.constant 5.000000e-01 : f32
    %165 = vector.broadcast %cst_71 : f32 to vector<8x384xf32>
    %166 = arith.mulf %165, %164 : vector<8x384xf32>
    %167 = vector.extract_strided_slice %166 {offsets = [0, 0], sizes = [8, 128], strides = [1, 1]} : vector<8x384xf32> to vector<8x128xf32>
    %168 = vector.extract_strided_slice %166 {offsets = [0, 128], sizes = [8, 128], strides = [1, 1]} : vector<8x384xf32> to vector<8x128xf32>
    %169 = vector.extract_strided_slice %166 {offsets = [0, 256], sizes = [8, 128], strides = [1, 1]} : vector<8x384xf32> to vector<8x128xf32>
    %170 = vector.extract_strided_slice %160 {offsets = [0, 384], sizes = [8, 128], strides = [1, 1]} : vector<8x512xf32> to vector<8x128xf32>
    %171 = math.tanh %170 : vector<8x128xf32>
    %172 = arith.mulf %168, %145 : vector<8x128xf32>
    %173 = arith.mulf %167, %171 : vector<8x128xf32>
    %174 = arith.addf %172, %173 : vector<8x128xf32>
    %175 = math.tanh %174 : vector<8x128xf32>
    %176 = arith.mulf %169, %175 : vector<8x128xf32>
    %c6_i32 = arith.constant 6 : i32
    %177 = arith.index_cast %c6_i32 : i32 to index
    %c0_72 = arith.constant 0 : index
    %c0_73 = arith.constant 0 : index
    %178 = vector.load %arg0[%177, %c0_72, %c0_73] : memref<8x8x1xi32, #tpu.memory_space<vmem>>, vector<1x8x1xi32>
    %179 = vector.shape_cast %178 : vector<1x8x1xi32> to vector<8x1xi32>
    %180 = vector.broadcast %179 : vector<8x1xi32> to vector<8x128xi32>
    %181 = arith.cmpi eq, %180, %0 : vector<8x128xi32>
    %cst_74 = arith.constant 1.000000e+00 : f32
    %cst_75 = arith.constant 0.000000e+00 : f32
    %182 = vector.broadcast %cst_74 : f32 to vector<8x128xf32>
    %183 = vector.broadcast %cst_75 : f32 to vector<8x128xf32>
    %184 = arith.select %181, %182, %183 : vector<8x128xi1>, vector<8x128xf32>
    %c0_76 = arith.constant 0 : index
    %c0_77 = arith.constant 0 : index
    %185 = vector.load %arg1[%c0_76, %c0_77] : memref<128x512xf32, #tpu.memory_space<vmem>>, vector<128x512xf32>
    %cst_78 = arith.constant dense<0.000000e+00> : vector<8x512xf32>
    %186 = tpu.matmul %184, %185, %cst_78 {dimension_numbers = #tpu.dot_dimension_numbers<[1], [0], [0], [1], [0, 0, 1, 1], [], []>} : vector<8x128xf32>, vector<128x512xf32>, vector<8x512xf32> -> vector<8x512xf32>
    %c0_79 = arith.constant 0 : index
    %c0_80 = arith.constant 0 : index
    %187 = vector.load %arg2[%c0_79, %c0_80] : memref<128x512xf32, #tpu.memory_space<vmem>>, vector<128x512xf32>
    %cst_81 = arith.constant dense<0.000000e+00> : vector<8x512xf32>
    %188 = tpu.matmul %176, %187, %cst_81 {dimension_numbers = #tpu.dot_dimension_numbers<[1], [0], [0], [1], [0, 0, 1, 1], [], []>} : vector<8x128xf32>, vector<128x512xf32>, vector<8x512xf32> -> vector<8x512xf32>
    %189 = arith.addf %186, %188 : vector<8x512xf32>
    %190 = vector.extract_strided_slice %189 {offsets = [0, 0], sizes = [8, 384], strides = [1, 1]} : vector<8x512xf32> to vector<8x384xf32>
    %191 = math.tanh %190 : vector<8x384xf32>
    %cst_82 = arith.constant 1.000000e+00 : f32
    %192 = vector.broadcast %cst_82 : f32 to vector<8x384xf32>
    %193 = arith.addf %192, %191 : vector<8x384xf32>
    %cst_83 = arith.constant 5.000000e-01 : f32
    %194 = vector.broadcast %cst_83 : f32 to vector<8x384xf32>
    %195 = arith.mulf %194, %193 : vector<8x384xf32>
    %196 = vector.extract_strided_slice %195 {offsets = [0, 0], sizes = [8, 128], strides = [1, 1]} : vector<8x384xf32> to vector<8x128xf32>
    %197 = vector.extract_strided_slice %195 {offsets = [0, 128], sizes = [8, 128], strides = [1, 1]} : vector<8x384xf32> to vector<8x128xf32>
    %198 = vector.extract_strided_slice %195 {offsets = [0, 256], sizes = [8, 128], strides = [1, 1]} : vector<8x384xf32> to vector<8x128xf32>
    %199 = vector.extract_strided_slice %189 {offsets = [0, 384], sizes = [8, 128], strides = [1, 1]} : vector<8x512xf32> to vector<8x128xf32>
    %200 = math.tanh %199 : vector<8x128xf32>
    %201 = arith.mulf %197, %174 : vector<8x128xf32>
    %202 = arith.mulf %196, %200 : vector<8x128xf32>
    %203 = arith.addf %201, %202 : vector<8x128xf32>
    %204 = math.tanh %203 : vector<8x128xf32>
    %205 = arith.mulf %198, %204 : vector<8x128xf32>
    %c7_i32 = arith.constant 7 : i32
    %206 = arith.index_cast %c7_i32 : i32 to index
    %c0_84 = arith.constant 0 : index
    %c0_85 = arith.constant 0 : index
    %207 = vector.load %arg0[%206, %c0_84, %c0_85] : memref<8x8x1xi32, #tpu.memory_space<vmem>>, vector<1x8x1xi32>
    %208 = vector.shape_cast %207 : vector<1x8x1xi32> to vector<8x1xi32>
    %209 = vector.broadcast %208 : vector<8x1xi32> to vector<8x128xi32>
    %210 = arith.cmpi eq, %209, %0 : vector<8x128xi32>
    %cst_86 = arith.constant 1.000000e+00 : f32
    %cst_87 = arith.constant 0.000000e+00 : f32
    %211 = vector.broadcast %cst_86 : f32 to vector<8x128xf32>
    %212 = vector.broadcast %cst_87 : f32 to vector<8x128xf32>
    %213 = arith.select %210, %211, %212 : vector<8x128xi1>, vector<8x128xf32>
    %c0_88 = arith.constant 0 : index
    %c0_89 = arith.constant 0 : index
    %214 = vector.load %arg1[%c0_88, %c0_89] : memref<128x512xf32, #tpu.memory_space<vmem>>, vector<128x512xf32>
    %cst_90 = arith.constant dense<0.000000e+00> : vector<8x512xf32>
    %215 = tpu.matmul %213, %214, %cst_90 {dimension_numbers = #tpu.dot_dimension_numbers<[1], [0], [0], [1], [0, 0, 1, 1], [], []>} : vector<8x128xf32>, vector<128x512xf32>, vector<8x512xf32> -> vector<8x512xf32>
    %c0_91 = arith.constant 0 : index
    %c0_92 = arith.constant 0 : index
    %216 = vector.load %arg2[%c0_91, %c0_92] : memref<128x512xf32, #tpu.memory_space<vmem>>, vector<128x512xf32>
    %cst_93 = arith.constant dense<0.000000e+00> : vector<8x512xf32>
    %217 = tpu.matmul %205, %216, %cst_93 {dimension_numbers = #tpu.dot_dimension_numbers<[1], [0], [0], [1], [0, 0, 1, 1], [], []>} : vector<8x128xf32>, vector<128x512xf32>, vector<8x512xf32> -> vector<8x512xf32>
    %218 = arith.addf %215, %217 : vector<8x512xf32>
    %219 = vector.extract_strided_slice %218 {offsets = [0, 0], sizes = [8, 384], strides = [1, 1]} : vector<8x512xf32> to vector<8x384xf32>
    %220 = math.tanh %219 : vector<8x384xf32>
    %cst_94 = arith.constant 1.000000e+00 : f32
    %221 = vector.broadcast %cst_94 : f32 to vector<8x384xf32>
    %222 = arith.addf %221, %220 : vector<8x384xf32>
    %cst_95 = arith.constant 5.000000e-01 : f32
    %223 = vector.broadcast %cst_95 : f32 to vector<8x384xf32>
    %224 = arith.mulf %223, %222 : vector<8x384xf32>
    %225 = vector.extract_strided_slice %224 {offsets = [0, 0], sizes = [8, 128], strides = [1, 1]} : vector<8x384xf32> to vector<8x128xf32>
    %226 = vector.extract_strided_slice %224 {offsets = [0, 128], sizes = [8, 128], strides = [1, 1]} : vector<8x384xf32> to vector<8x128xf32>
    %227 = vector.extract_strided_slice %224 {offsets = [0, 256], sizes = [8, 128], strides = [1, 1]} : vector<8x384xf32> to vector<8x128xf32>
    %228 = vector.extract_strided_slice %218 {offsets = [0, 384], sizes = [8, 128], strides = [1, 1]} : vector<8x512xf32> to vector<8x128xf32>
    %229 = math.tanh %228 : vector<8x128xf32>
    %230 = arith.mulf %226, %203 : vector<8x128xf32>
    %231 = arith.mulf %225, %229 : vector<8x128xf32>
    %232 = arith.addf %230, %231 : vector<8x128xf32>
    %233 = math.tanh %232 : vector<8x128xf32>
    %234 = arith.mulf %227, %233 : vector<8x128xf32>
    %c8_i32 = arith.constant 8 : i32
    %c0_96 = arith.constant 0 : index
    %c0_97 = arith.constant 0 : index
    %235 = vector.load %arg3[%c0_96, %c0_97] : memref<1x128xf32, #tpu.memory_space<vmem>>, vector<1x128xf32>
    %236 = vector.broadcast %235 : vector<1x128xf32> to vector<8x128xf32>
    %237 = arith.mulf %234, %236 : vector<8x128xf32>
    %cst_98 = arith.constant dense<0.000000e+00> : vector<8xf32>
    %238 = vector.multi_reduction <add>, %237, %cst_98 [1] : vector<8x128xf32> to vector<8xf32>
    %239 = vector.shape_cast %238 : vector<8xf32> to vector<8x1xf32>
    %c0_99 = arith.constant 0 : index
    %c0_100 = arith.constant 0 : index
    %240 = vector.load %arg4[%c0_99, %c0_100] : memref<1x1xf32, #tpu.memory_space<vmem>>, vector<1x1xf32>
    %241 = vector.broadcast %240 : vector<1x1xf32> to vector<8x1xf32>
    %242 = arith.addf %239, %241 : vector<8x1xf32>
    %c0_101 = arith.constant 0 : index
    %c0_102 = arith.constant 0 : index
    %243 = vector.load %arg5[%c0_101, %c0_102] : memref<8x1xf32, #tpu.memory_space<vmem>>, vector<8x1xf32>
    tpu.vector_store %arg5[%c0_101, %c0_102], %242 {strides = array<i32>} : memref<8x1xf32, #tpu.memory_space<vmem>>, vector<8x1xf32>,
    return
  }
}

</mosaic_0001>

<bundles_post_ra>
// kernel: cpg_predictor_forward.1
= control target key start
LH: loop header
LB: loop body
LE: loop exit
PB: predicated region body
PF: predicated region fallthrough
CT: control target
= control target key end

     0   :  { %s4689_s0 = inlined_call_operand.vmem [shape: s32[8,8,1], index: 0, kind: input, shape index: {}]   ;;  %s4690_s1 = inlined_call_operand.hbm [shape: f32[128,512], index: 1, kind: input, shape index: {}]   ;;  %s4691_s2 = inlined_call_operand.hbm [shape: f32[128,512], index: 2, kind: input, shape index: {}]   ;;  %s4692_s3 = inlined_call_operand.vmem [shape: f32[1,128], index: 3, kind: input, shape index: {}]   ;;  %s4693_s4 = inlined_call_operand.<no memory space> [shape: f32[1,1], index: 4, kind: input, shape index: {}]   ;;  %s4694_s5 = inlined_call_operand.vmem [shape: f32[8,1], index: 5, kind: output, shape index: {}]  }
   0x1   :  { %v10_v0 = vstv %s4693_s4 }
   0x2   :  { %11 = vst [vmem:[#allocation2] sm:$0x1] %v10_v0 }
   0x3   :  { %12 = vsyncpa [#allocation4], 0 }
   0x4   :  { %13 = vsyncpa [#allocation6], 0  ;;  %s3871_s20 = smov [#allocation3]   ;;  %s3823_s24 = scalar_lea.hbm %s4690_s1, 8192 }
   0x5   :  { %s21_s21 = sshll.u32 %s3871_s20, 4  ;;  %p3824_p0 = scmp.ne.s32.totalorder %s4690_s1, %s3823_s24  ;;  %s22_s21 = int_to_ptr.vmem [resolvable:$true] %s21_s21 }
   0x6   :  { %p3827_p1 = scmp.lt.u32.totalorder %s3823_s24, %s4690_s1 }
   0x8   :  { %p3829_p2 = pnand %p3827_p1, %p3824_p0 }
   0xa   :  { %3832 = shalt.err (!%p3829_p2)
}
   0xb   :  { %s3833_s4 = scalar_lea.vmem %s22_s21, 8192  ;;  %p3838_p4 = scmp.lt.s32.totalorder %s22_s21, %s22_s21 }
   0xc   :  { %p3834_p3 = scmp.ne.s32.totalorder %s22_s21, %s3833_s4  ;;  %p3839_p5 = scmp.lt.s32.totalorder %s3833_s4, %s3833_s4 }
   0xe   :  { %p3840_p6 = por %p3839_p5, %p3838_p4 }
  0x10   :  { %p3841_p7 = pnand %p3840_p6, %p3834_p3 }
  0x12   :  { %3844 = shalt.err (!%p3841_p7)
}
  0x13   :  { %s3872_s29 = smov 512   ;;  %s3873_s30 = smov 32  }
  0x14   :  { %27 = dma.hbm_to_vmem [thread:$0]  %s4690_s1, 8192, %s22_s21, [#allocation4], %s3872_s29, %s3872_s29, %s3873_s30  }
  0x15   :  { %s3874_s8 = smov [#allocation5]   ;;  %s3845_s12 = scalar_lea.hbm %s4691_s2, 8192 }
  0x16   :  { %s33_s9 = sshll.u32 %s3874_s8, 4  ;;  %p3846_p8 = scmp.ne.s32.totalorder %s4691_s2, %s3845_s12  ;;  %s34_s9 = int_to_ptr.vmem [resolvable:$true] %s33_s9 }
  0x17   :  { %p3849_p9 = scmp.lt.u32.totalorder %s3845_s12, %s4691_s2 }
  0x19   :  { %p3851_p10 = pnand %p3849_p9, %p3846_p8 }
  0x1b   :  { %3854 = shalt.err (!%p3851_p10)
}
  0x1c   :  { %s3855_s17 = scalar_lea.vmem %s34_s9, 8192  ;;  %p3860_p12 = scmp.lt.s32.totalorder %s34_s9, %s34_s9 }
  0x1d   :  { %p3856_p11 = scmp.ne.s32.totalorder %s34_s9, %s3855_s17  ;;  %p3861_p13 = scmp.lt.s32.totalorder %s3855_s17, %s3855_s17 }
  0x1f   :  { %p3862_p0 = por %p3861_p13, %p3860_p12 }
  0x21   :  { %p3863_p1 = pnand %p3862_p0, %p3856_p11 }
  0x23   :  { %3866 = shalt.err (!%p3863_p1)
}
  0x24   :  { %39 = dma.hbm_to_vmem [thread:$0]  %s4691_s2, 8192, %s34_s9, [#allocation6], %s3872_s29, %s3872_s29, %s3873_s30  }
  0x25   :  { %3867 = dma.done.wait [#allocation4], 8192  }
  0x26   :  { %3868 = vsyncadd [#allocation4], 4294959104 }
  0x27   :  { %3869 = dma.done.wait [#allocation6], 8192  }
  0x28   :  { %3870 = vsyncadd [#allocation6], 4294959104  ;;  %v3875_v1 = vmov 0   ;;  %v4695_v2 = vmov 0.0   ;;  %v52_v3 = vld [vmem:[%s4689_s0] sm:$0xff]  ;;  %v2655_v4 = vld [vmem:[%s4689_s0 + $0x8] sm:$0xff] }
  0x29   :  { %3741 = vset.pattern.permute.xlu0 %v3875_v1  ;;  %250 = vmatprep.mubr.f32.mxu0 %v4695_v2  ;;  %v123_v5 = vld [vmem:[#allocation5 + $0x8] sm:$0xff]  ;;  %v125_v8 = vld [vmem:[#allocation5 + $0x18] sm:$0xff]  ;;  %v122_v10 = vld [vmem:[#allocation5] sm:$0xff]  ;;  %vm2645_vm8 = vcmask 7168  }
  0x2a   :  { %321 = vmatprep.mubr.f32.mxu1 %v4695_v2  ;;  %3742 = vset.pattern.permute.xlu1 %v3875_v1  ;;  %v127_v6 = vld [vmem:[#allocation5 + $0x28] sm:$0xff]  ;;  %v129_v9 = vld [vmem:[#allocation5 + $0x38] sm:$0xff]  ;;  %v126_v12 = vld [vmem:[#allocation5 + $0x20] sm:$0xff] }
  0x2b   :  { %54 = vperm.xlu0 %3741, %v52_v3   ;;  %v3943_v7 = vpack.c.bf16 %v127_v6, %v123_v5  ;;  %v3945_v11 = vpack.c.bf16 %v129_v9, %v125_v8  ;;  %v124_v13 = vld [vmem:[#allocation5 + $0x10] sm:$0xff]  ;;  %v2664_v15 = vld [vmem:[%s4689_s0 + $0x20] sm:$0xff]  ;;  %v3951_v16 = vpack.c.bf16 %v126_v12, %v122_v10  ;;  %v131_v18 = vld [vmem:[#allocation5 + $0x48] sm:$0xff] }
  0x2c   :  { %v128_v14 = vld [vmem:[#allocation5 + $0x30] sm:$0xff]  ;;  %v135_v19 = vld [vmem:[#allocation5 + $0x68] sm:$0xff]  ;;  %v133_v20 = vld [vmem:[#allocation5 + $0x58] sm:$0xff] }
  0x2d   :  { %2679 = vmatprep.subr.bf16.mxu0 %v3943_v7  ;;  %v3953_v17 = vpack.c.bf16 %v128_v14, %v124_v13  ;;  %2711 = vmatprep.subr.bf16.mxu1 %v3945_v11  ;;  %v3956_v21 = vpack.c.bf16 %v135_v19, %v131_v18  ;;  %v137_v22 = vld [vmem:[#allocation5 + $0x78] sm:$0xff]  ;;  %v130_v23 = vld [vmem:[#allocation5 + $0x40] sm:$0xff]  ;;  %v132_v27 = vld [vmem:[#allocation5 + $0x50] sm:$0xff] }
  0x2e   :  { %v134_v24 = vld [vmem:[#allocation5 + $0x60] sm:$0xff]  ;;  %2681 = vmatpush1.bf16.msra.mxu0 %v3951_v16  ;;  %v3960_v25 = vpack.c.bf16 %v137_v22, %v133_v20  ;;  %v136_v28 = vld [vmem:[#allocation5 + $0x70] sm:$0xff]  ;;  %v139_v29 = vld [vmem:[#allocation5 + $0x88] sm:$0xff] }
  0x2f   :  { %488 = vperm.xlu0 %3741, %v2655_v4   ;;  %2713 = vmatpush1.bf16.msra.mxu1 %v3953_v17  ;;  %v3962_v26 = vpack.c.bf16 %v134_v24, %v130_v23  ;;  %v3965_v30 = vpack.c.bf16 %v136_v28, %v132_v27  ;;  %v143_v31 = vld [vmem:[#allocation5 + $0xa8] sm:$0xff]  ;;  %v141_v32 = vld [vmem:[#allocation5 + $0x98] sm:$0xff]  ;;  %v138_v37 = vld [vmem:[#allocation5 + $0x80] sm:$0xff] }
  0x30   :  { %2683 = vmatprep.subr.bf16.mxu0 %v3956_v21  ;;  %v145_v33 = vld [vmem:[#allocation5 + $0xb8] sm:$0xff]  ;;  %v2670_v34 = vld [vmem:[%s4689_s0 + $0x30] sm:$0xff]  ;;  %2715 = vmatprep.subr.bf16.mxu1 %v3960_v25  ;;  %v3971_v35 = vpack.c.bf16 %v143_v31, %v139_v29  ;;  %v142_v38 = vld [vmem:[#allocation5 + $0xa0] sm:$0xff] }
  0x31   :  { %v3973_v36 = vpack.c.bf16 %v145_v33, %v141_v32  ;;  %v140_v39 = vld [vmem:[#allocation5 + $0x90] sm:$0xff]  ;;  %v147_v41 = vld [vmem:[#allocation5 + $0xc8] sm:$0xff]  ;;  %v3977_v43 = vpack.c.bf16 %v142_v38, %v138_v37  ;;  %v149_v45 = vld [vmem:[#allocation5 + $0xd8] sm:$0xff] }
  0x32   :  { %v144_v40 = vld [vmem:[#allocation5 + $0xb0] sm:$0xff]  ;;  %v151_v42 = vld [vmem:[#allocation5 + $0xe8] sm:$0xff]  ;;  %2685 = vmatpush1.bf16.msra.mxu0 %v3962_v26  ;;  %v153_v46 = vld [vmem:[#allocation5 + $0xf8] sm:$0xff] }
  0x33   :  { %1406 = vperm.xlu0 %3741, %v2664_v15   ;;  %2717 = vmatpush1.bf16.msra.mxu1 %v3965_v30  ;;  %v3979_v44 = vpack.c.bf16 %v144_v40, %v140_v39  ;;  %v146_v47 = vld [vmem:[#allocation5 + $0xc0] sm:$0xff]  ;;  %v3983_v48 = vpack.c.bf16 %v151_v42, %v147_v41  ;;  %v3985_v49 = vpack.c.bf16 %v153_v46, %v149_v45  ;;  %v148_v51 = vld [vmem:[#allocation5 + $0xd0] sm:$0xff]  ;;  %v155_v53 = vld [vmem:[#allocation5 + $0x108] sm:$0xff] }
  0x34   :  { %2687 = vmatprep.subr.bf16.mxu0 %v3971_v35  ;;  %2719 = vmatprep.subr.bf16.mxu1 %v3973_v36  ;;  %v150_v50 = vld [vmem:[#allocation5 + $0xe0] sm:$0xff]  ;;  %v152_v52 = vld [vmem:[#allocation5 + $0xf0] sm:$0xff]  ;;  %v159_v54 = vld [vmem:[#allocation5 + $0x128] sm:$0xff] }
  0x35   :  { %v157_v55 = vld [vmem:[#allocation5 + $0x118] sm:$0xff]  ;;  %v3989_v57 = vpack.c.bf16 %v150_v50, %v146_v47  ;;  %v3991_v58 = vpack.c.bf16 %v152_v52, %v148_v51  ;;  %v154_v59 = vld [vmem:[#allocation5 + $0x100] sm:$0xff]  ;;  %v3995_v61 = vpack.c.bf16 %v159_v54, %v155_v53  ;;  %v156_v63 = vld [vmem:[#allocation5 + $0x110] sm:$0xff] }
  0x36   :  { %v161_v56 = vld [vmem:[#allocation5 + $0x138] sm:$0xff]  ;;  %2689 = vmatpush1.bf16.msra.mxu0 %v3977_v43  ;;  %v158_v60 = vld [vmem:[#allocation5 + $0x120] sm:$0xff]  ;;  %v160_v0 = vld [vmem:[#allocation5 + $0x130] sm:$0xff] }
  0x37   :  { %2018 = vperm.xlu0 %3741, %v2670_v34   ;;  %2721 = vmatpush1.bf16.msra.mxu1 %v3979_v44  ;;  %4759 = vst [vmem:[#allocation9_spill] sm:$0xff] %v3989_v57  ;;  %4760 = vst [vmem:[#allocation10_spill] sm:$0xff] %v3991_v58  ;;  %v3997_v62 = vpack.c.bf16 %v161_v56, %v157_v55  ;;  %v163_v1 = vld [vmem:[#allocation5 + $0x148] sm:$0xff]  ;;  %v165_v4 = vld [vmem:[#allocation5 + $0x158] sm:$0xff]  ;;  %v4001_v6 = vpack.c.bf16 %v158_v60, %v154_v59 }
  0x38   :  { %2691 = vmatprep.subr.bf16.mxu0 %v3983_v48  ;;  %2723 = vmatprep.subr.bf16.mxu1 %v3985_v49  ;;  %4761 = vst [vmem:[#allocation11_spill] sm:$0xff] %v3995_v61  ;;  %v167_v3 = vld [vmem:[#allocation5 + $0x168] sm:$0xff]  ;;  %v169_v5 = vld [vmem:[#allocation5 + $0x178] sm:$0xff]  ;;  %v4003_v8 = vpack.c.bf16 %v160_v0, %v156_v63  ;;  %v162_v9 = vld [vmem:[#allocation5 + $0x140] sm:$0xff] }
  0x39   :  { %4762 = vst [vmem:[#allocation12_spill] sm:$0xff] %v3997_v62  ;;  %4763 = vst [vmem:[#allocation13_spill] sm:$0xff] %v4001_v6  ;;  %v166_v10 = vld [vmem:[#allocation5 + $0x160] sm:$0xff]  ;;  %v4007_v12 = vpack.c.bf16 %v167_v3, %v163_v1  ;;  %v4009_v13 = vpack.c.bf16 %v169_v5, %v165_v4  ;;  %v164_v14 = vld [vmem:[#allocation5 + $0x150] sm:$0xff] }
  0x3a   :  { %2693 = vmatpush1.bf16.msra.mxu0 %v3989_v57  ;;  %4764 = vst [vmem:[#allocation14_spill] sm:$0xff] %v4003_v8  ;;  %v168_v15 = vld [vmem:[#allocation5 + $0x170] sm:$0xff]  ;;  %v171_v18 = vld [vmem:[#allocation5 + $0x188] sm:$0xff]  ;;  %v173_v20 = vld [vmem:[#allocation5 + $0x198] sm:$0xff]  ;;  %v4013_v23 = vpack.c.bf16 %v166_v10, %v162_v9 }
  0x3b   :  { %2725 = vmatpush1.bf16.msra.mxu1 %v3991_v58  ;;  %2695 = vmatprep.subr.bf16.mxu0 %v3995_v61  ;;  %4765 = vst [vmem:[#allocation15_spill] sm:$0xff] %v4007_v12  ;;  %4766 = vst [vmem:[#allocation16_spill] sm:$0xff] %v4009_v13  ;;  %v175_v19 = vld [vmem:[#allocation5 + $0x1a8] sm:$0xff]  ;;  %v177_v22 = vld [vmem:[#allocation5 + $0x1b8] sm:$0xff]  ;;  %v4015_v24 = vpack.c.bf16 %v168_v15, %v164_v14 }
  0x3c   :  { %2727 = vmatprep.subr.bf16.mxu1 %v3997_v62  ;;  %4767 = vst [vmem:[#allocation17_spill] sm:$0xff] %v4013_v23  ;;  %v170_v27 = vld [vmem:[#allocation5 + $0x180] sm:$0xff]  ;;  %v4019_v29 = vpack.c.bf16 %v175_v19, %v171_v18  ;;  %v4021_v31 = vpack.c.bf16 %v177_v22, %v173_v20  ;;  %v172_v32 = vld [vmem:[#allocation5 + $0x190] sm:$0xff]  ;;  %v179_v34 = vld [vmem:[#allocation5 + $0x1c8] sm:$0xff] }
  0x3d   :  { %4768 = vst [vmem:[#allocation18_spill] sm:$0xff] %v4015_v24  ;;  %v174_v28 = vld [vmem:[#allocation5 + $0x1a0] sm:$0xff]  ;;  %v176_v33 = vld [vmem:[#allocation5 + $0x1b0] sm:$0xff]  ;;  %v183_v37 = vld [vmem:[#allocation5 + $0x1e8] sm:$0xff] }
  0x3e   :  { %2697 = vmatpush1.bf16.msra.mxu0 %v4001_v6  ;;  %4769 = vst [vmem:[#allocation19_spill] sm:$0xff] %v4019_v29  ;;  %4770 = vst [vmem:[#allocation20_spill] sm:$0xff] %v4021_v31  ;;  %v181_v38 = vld [vmem:[#allocation5 + $0x1d8] sm:$0xff]  ;;  %v4025_v40 = vpack.c.bf16 %v174_v28, %v170_v27  ;;  %v4027_v41 = vpack.c.bf16 %v176_v33, %v172_v32  ;;  %v178_v42 = vld [vmem:[#allocation5 + $0x1c0] sm:$0xff]  ;;  %v4031_v46 = vpack.c.bf16 %v183_v37, %v179_v34 }
  0x3f   :  { %2729 = vmatpush1.bf16.msra.mxu1 %v4003_v8  ;;  %2699 = vmatprep.subr.bf16.mxu0 %v4007_v12  ;;  %v185_v39 = vld [vmem:[#allocation5 + $0x1f8] sm:$0xff]  ;;  %v182_v45 = vld [vmem:[#allocation5 + $0x1e0] sm:$0xff]  ;;  %v180_v50 = vld [vmem:[#allocation5 + $0x1d0] sm:$0xff] }
  0x40   :  { %2731 = vmatprep.subr.bf16.mxu1 %v4009_v13  ;;  %4771 = vst [vmem:[#allocation21_spill] sm:$0xff] %v4025_v40  ;;  %4772 = vst [vmem:[#allocation22_spill] sm:$0xff] %v4027_v41  ;;  %v4033_v47 = vpack.c.bf16 %v185_v39, %v181_v38  ;;  %v184_v51 = vld [vmem:[#allocation5 + $0x1f0] sm:$0xff]  ;;  %v59_v52 = vld [vmem:[#allocation3 + $0x8] sm:$0xff]  ;;  %v4037_v56 = vpack.c.bf16 %v182_v45, %v178_v42 }
  0x41   :  { %4773 = vst [vmem:[#allocation23_spill] sm:$0xff] %v4031_v46  ;;  %v63_v53 = vld [vmem:[#allocation3 + $0x28] sm:$0xff]  ;;  %v61_v54 = vld [vmem:[#allocation3 + $0x18] sm:$0xff]  ;;  %v4039_v59 = vpack.c.bf16 %v184_v51, %v180_v50  ;;  %v58_v60 = vld [vmem:[#allocation3] sm:$0xff] }
  0x42   :  { %2701 = vmatpush1.bf16.msra.mxu0 %v4013_v23  ;;  %4774 = vst [vmem:[#allocation24_spill] sm:$0xff] %v4033_v47  ;;  %v65_v55 = vld [vmem:[#allocation3 + $0x38] sm:$0xff]  ;;  %4775 = vst [vmem:[#allocation25_spill] sm:$0xff] %v4037_v56  ;;  %v62_v63 = vld [vmem:[#allocation3 + $0x20] sm:$0xff]  ;;  %v4043_v0 = vpack.c.bf16 %v63_v53, %v59_v52 }
  0x43   :  { %2733 = vmatpush1.bf16.msra.mxu1 %v4015_v24  ;;  %2703 = vmatprep.subr.bf16.mxu0 %v4019_v29  ;;  %4776 = vst [vmem:[#allocation26_spill] sm:$0xff] %v4039_v59  ;;  %v4045_v1 = vpack.c.bf16 %v65_v55, %v61_v54  ;;  %v60_v3 = vld [vmem:[#allocation3 + $0x10] sm:$0xff]  ;;  %v67_v5 = vld [vmem:[#allocation3 + $0x48] sm:$0xff]  ;;  %v69_v10 = vld [vmem:[#allocation3 + $0x58] sm:$0xff]  ;;  %v4049_v15 = vpack.c.bf16 %v62_v63, %v58_v60 }
  0x44   :  { %2735 = vmatprep.subr.bf16.mxu1 %v4021_v31  ;;  %4777 = vst [vmem:[#allocation27_spill] sm:$0xff] %v4043_v0  ;;  %v64_v4 = vld [vmem:[#allocation3 + $0x30] sm:$0xff]  ;;  %v71_v9 = vld [vmem:[#allocation3 + $0x68] sm:$0xff]  ;;  %v73_v14 = vld [vmem:[#allocation3 + $0x78] sm:$0xff] }
  0x45   :  { %4778 = vst [vmem:[#allocation28_spill] sm:$0xff] %v4045_v1  ;;  %v4051_v18 = vpack.c.bf16 %v64_v4, %v60_v3  ;;  %v66_v19 = vld [vmem:[#allocation3 + $0x40] sm:$0xff]  ;;  %v4055_v22 = vpack.c.bf16 %v71_v9, %v67_v5  ;;  %v4057_v27 = vpack.c.bf16 %v73_v14, %v69_v10  ;;  %v68_v28 = vld [vmem:[#allocation3 + $0x50] sm:$0xff]  ;;  %v75_v33 = vld [vmem:[#allocation3 + $0x88] sm:$0xff] }
  0x46   :  { %2705 = vmatpush1.bf16.msra.mxu0 %v4025_v40  ;;  %v70_v20 = vld [vmem:[#allocation3 + $0x60] sm:$0xff]  ;;  %v72_v32 = vld [vmem:[#allocation3 + $0x70] sm:$0xff]  ;;  %v79_v34 = vld [vmem:[#allocation3 + $0xa8] sm:$0xff] }
  0x47   :  { %2737 = vmatpush1.bf16.msra.mxu1 %v4027_v41  ;;  %2707 = vmatprep.subr.bf16.mxu0 %v4031_v46  ;;  %v77_v37 = vld [vmem:[#allocation3 + $0x98] sm:$0xff]  ;;  %v4063_v39 = vpack.c.bf16 %v70_v20, %v66_v19  ;;  %v4065_v42 = vpack.c.bf16 %v72_v32, %v68_v28  ;;  %v74_v45 = vld [vmem:[#allocation3 + $0x80] sm:$0xff]  ;;  %v4069_v51 = vpack.c.bf16 %v79_v34, %v75_v33  ;;  %v76_v53 = vld [vmem:[#allocation3 + $0x90] sm:$0xff] }
  0x48   :  { %2739 = vmatprep.subr.bf16.mxu1 %v4033_v47  ;;  %v81_v38 = vld [vmem:[#allocation3 + $0xb8] sm:$0xff]  ;;  %v78_v50 = vld [vmem:[#allocation3 + $0xa0] sm:$0xff]  ;;  %v80_v54 = vld [vmem:[#allocation3 + $0xb0] sm:$0xff] }
  0x49   :  { %v4071_v52 = vpack.c.bf16 %v81_v38, %v77_v37  ;;  %v83_v55 = vld [vmem:[#allocation3 + $0xc8] sm:$0xff]  ;;  %v85_v63 = vld [vmem:[#allocation3 + $0xd8] sm:$0xff]  ;;  %v4077_v4 = vpack.c.bf16 %v78_v50, %v74_v45  ;;  %v4079_v5 = vpack.c.bf16 %v80_v54, %v76_v53  ;;  %v82_v9 = vld [vmem:[#allocation3 + $0xc0] sm:$0xff] }
  0x4a   :  { %2709 = vmatpush1.bf16.msra.mxu0 %v4037_v56  ;;  %v87_v60 = vld [vmem:[#allocation3 + $0xe8] sm:$0xff]  ;;  %v89_v3 = vld [vmem:[#allocation3 + $0xf8] sm:$0xff]  ;;  %v86_v10 = vld [vmem:[#allocation3 + $0xe0] sm:$0xff] }
  0x4b   :  { %2741 = vmatpush1.bf16.msra.mxu1 %v4039_v59  ;;  %2743 = vmatprep.subr.bf16.mxu0 %v4043_v0  ;;  %4779 = vst [vmem:[#allocation29_spill] sm:$0xff] %v4077_v4  ;;  %4780 = vst [vmem:[#allocation30_spill] sm:$0xff] %v4079_v5  ;;  %v4083_v14 = vpack.c.bf16 %v87_v60, %v83_v55  ;;  %v4085_v19 = vpack.c.bf16 %v89_v3, %v85_v63  ;;  %v84_v20 = vld [vmem:[#allocation3 + $0xd0] sm:$0xff]  ;;  %v91_v32 = vld [vmem:[#allocation3 + $0x108] sm:$0xff] }
  0x4c   :  { %2775 = vmatprep.subr.bf16.mxu1 %v4045_v1  ;;  %v88_v28 = vld [vmem:[#allocation3 + $0xf0] sm:$0xff]  ;;  %v95_v33 = vld [vmem:[#allocation3 + $0x128] sm:$0xff]  ;;  %v93_v34 = vld [vmem:[#allocation3 + $0x118] sm:$0xff]  ;;  %v4089_v38 = vpack.c.bf16 %v86_v10, %v82_v9 }
  0x4d   :  { %251 = vmatmul.mubr.f32.vlgmr.msra.gmra.mrb[0].mxu0 %v4695_v2  ;;  %4781 = vst [vmem:[#allocation31_spill] sm:$0xff] %v4083_v14  ;;  %4782 = vst [vmem:[#allocation32_spill] sm:$0xff] %v4085_v19  ;;  %v97_v37 = vld [vmem:[#allocation3 + $0x138] sm:$0xff]  ;;  %v4091_v45 = vpack.c.bf16 %v88_v28, %v84_v20  ;;  %v90_v50 = vld [vmem:[#allocation3 + $0x100] sm:$0xff]  ;;  %v4095_v54 = vpack.c.bf16 %v95_v33, %v91_v32 }
  0x4e   :  { %322 = vmatmul.mubr.f32.vlgmr.msra.gmra.mrb[0].mxu1 %v4695_v2  ;;  %2745 = vmatpush1.bf16.msra.mxu0 %v4049_v15  ;;  %4783 = vst [vmem:[#allocation33_spill] sm:$0xff] %v4089_v38  ;;  %v94_v53 = vld [vmem:[#allocation3 + $0x120] sm:$0xff]  ;;  %v4097_v55 = vpack.c.bf16 %v97_v37, %v93_v34  ;;  %v92_v60 = vld [vmem:[#allocation3 + $0x110] sm:$0xff]  ;;  %v99_v3 = vld [vmem:[#allocation3 + $0x148] sm:$0xff] }
  0x4f   :  { %2777 = vmatpush1.bf16.msra.mxu1 %v4051_v18  ;;  %2747 = vmatprep.subr.bf16.mxu0 %v4055_v22  ;;  %4784 = vst [vmem:[#allocation34_spill] sm:$0xff] %v4091_v45  ;;  %4785 = vst [vmem:[#allocation35_spill] sm:$0xff] %v4095_v54  ;;  %v96_v63 = vld [vmem:[#allocation3 + $0x130] sm:$0xff]  ;;  %v4101_v9 = vpack.c.bf16 %v94_v53, %v90_v50  ;;  %v98_v20 = vld [vmem:[#allocation3 + $0x140] sm:$0xff] }
  0x50   :  { %2779 = vmatprep.subr.bf16.mxu1 %v4057_v27  ;;  %392 = vmatprep.mubr.f32.mxu0 %v4695_v2  ;;  %4786 = vst [vmem:[#allocation36_spill] sm:$0xff] %v4097_v55  ;;  %v4103_v10 = vpack.c.bf16 %v96_v63, %v92_v60  ;;  %v102_v28 = vld [vmem:[#allocation3 + $0x160] sm:$0xff]  ;;  %v100_v34 = vld [vmem:[#allocation3 + $0x150] sm:$0xff] }
  0x51   :  { %463 = vmatprep.mubr.f32.mxu1 %v4695_v2  ;;  %v103_v2 = vld [vmem:[#allocation3 + $0x168] sm:$0xff]  ;;  %4787 = vst [vmem:[#allocation37_spill] sm:$0xff] %v4101_v9  ;;  %v104_v37 = vld [vmem:[#allocation3 + $0x170] sm:$0xff]  ;;  %v4113_v50 = vpack.c.bf16 %v102_v28, %v98_v20  ;;  %v106_v60 = vld [vmem:[#allocation3 + $0x180] sm:$0xff] }
  0x52   :  { %2749 = vmatpush1.bf16.msra.mxu0 %v4063_v39  ;;  %4788 = vst [vmem:[#allocation38_spill] sm:$0xff] %v4103_v10  ;;  %v4107_v32 = vpack.c.bf16 %v103_v2, %v99_v3  ;;  %v4115_v53 = vpack.c.bf16 %v104_v37, %v100_v34  ;;  %v110_v63 = vld [vmem:[#allocation3 + $0x1a0] sm:$0xff]  ;;  %v112_v3 = vld [vmem:[#allocation3 + $0x1b0] sm:$0xff] }
  0x53   :  { %2781 = vmatpush1.bf16.msra.mxu1 %v4065_v42  ;;  %2751 = vmatprep.subr.bf16.mxu0 %v4069_v51  ;;  %v4125_v20 = vpack.c.bf16 %v110_v63, %v106_v60  ;;  %v114_v34 = vld [vmem:[#allocation3 + $0x1c0] sm:$0xff]  ;;  %v120_v37 = vld [vmem:[#allocation3 + $0x1f0] sm:$0xff] }
  0x54   :  { %2783 = vmatprep.subr.bf16.mxu1 %v4071_v52 }
  0x56   :  { %2753 = vmatpush1.bf16.msra.mxu0 %v4077_v4  ;;  %v101_v4 = vld [vmem:[#allocation3 + $0x158] sm:$0xff] }
  0x57   :  { %2785 = vmatpush1.bf16.msra.mxu1 %v4079_v5  ;;  %2755 = vmatprep.subr.bf16.mxu0 %v4083_v14  ;;  %v105_v5 = vld [vmem:[#allocation3 + $0x178] sm:$0xff] }
  0x58   :  { %2787 = vmatprep.subr.bf16.mxu1 %v4085_v19  ;;  %v4109_v33 = vpack.c.bf16 %v105_v5, %v101_v4  ;;  %v107_v19 = vld [vmem:[#allocation3 + $0x188] sm:$0xff]  ;;  %v109_v14 = vld [vmem:[#allocation3 + $0x198] sm:$0xff]  ;;  %v108_v5 = vld [vmem:[#allocation3 + $0x190] sm:$0xff] }
  0x59   :  { %v4127_v28 = vpack.c.bf16 %v112_v3, %v108_v5  ;;  %v4789_v5 = vmov 0.0   ;;  %v2658_v3 = vld [vmem:[%s4689_s0 + $0x10] sm:$0xff] }
  0x5a   :  { %2757 = vmatpush1.bf16.msra.mxu0 %v4089_v38  ;;  %v111_v38 = vld [vmem:[#allocation3 + $0x1a8] sm:$0xff]  ;;  %794 = vperm.xlu1 %3742, %v2658_v3  }
  0x5b   :  { %2789 = vmatpush1.bf16.msra.mxu1 %v4091_v45  ;;  %2759 = vmatprep.subr.bf16.mxu0 %v4095_v54  ;;  %v113_v45 = vld [vmem:[#allocation3 + $0x1b8] sm:$0xff]  ;;  %v4119_v2 = vpack.c.bf16 %v111_v38, %v107_v19  ;;  %v118_v38 = vld [vmem:[#allocation3 + $0x1e0] sm:$0xff] }
  0x5c   :  { %2791 = vmatprep.subr.bf16.mxu1 %v4097_v55  ;;  %v4121_v4 = vpack.c.bf16 %v113_v45, %v109_v14  ;;  %v115_v55 = vld [vmem:[#allocation3 + $0x1c8] sm:$0xff]  ;;  %v117_v54 = vld [vmem:[#allocation3 + $0x1d8] sm:$0xff]  ;;  %v116_v45 = vld [vmem:[#allocation3 + $0x1d0] sm:$0xff]  ;;  %v4137_v60 = vpack.c.bf16 %v118_v38, %v114_v34 }
  0x5d   :  { %v4139_v63 = vpack.c.bf16 %v120_v37, %v116_v45  ;;  %v2661_v34 = vld [vmem:[%s4689_s0 + $0x18] sm:$0xff]  ;;  %v2667_v38 = vld [vmem:[%s4689_s0 + $0x28] sm:$0xff] }
  0x5e   :  { %2761 = vmatpush1.bf16.msra.mxu0 %v4101_v9  ;;  %v119_v9 = vld [vmem:[#allocation3 + $0x1e8] sm:$0xff]  ;;  %1100 = vperm.xlu1 %3742, %v2661_v34   ;;  %v2673_v45 = vld [vmem:[%s4689_s0 + $0x38] sm:$0xff] }
  0x5f   :  { %2793 = vmatpush1.bf16.msra.mxu1 %v4103_v10  ;;  %2763 = vmatprep.subr.bf16.mxu0 %v4107_v32  ;;  %v121_v10 = vld [vmem:[#allocation3 + $0x1f8] sm:$0xff]  ;;  %v4131_v14 = vpack.c.bf16 %v119_v9, %v115_v55 }
  0x60   :  { %2795 = vmatprep.subr.bf16.mxu1 %v4109_v33  ;;  %v4133_v19 = vpack.c.bf16 %v121_v10, %v117_v54  ;;  %v50_v54 = vlaneseq  ;;  %v4717_v10 = vmov 1.0  }
  0x62   :  { %2765 = vmatpush1.bf16.msra.mxu0 %v4113_v50  ;;  %v4147_v55 = vand.u32 127, %v50_v54  ;;  %1712 = vperm.xlu1 %3742, %v2667_v38  }
  0x63   :  { %2797 = vmatpush1.bf16.msra.mxu1 %v4115_v53  ;;  %2767 = vmatprep.subr.bf16.mxu0 %v4119_v2 }
  0x64   :  { %2799 = vmatprep.subr.bf16.mxu1 %v4121_v4 }
  0x66   :  { %2769 = vmatpush1.bf16.msra.mxu0 %v4125_v20  ;;  %2324 = vperm.xlu1 %3742, %v2673_v45  }
  0x67   :  { %2801 = vmatpush1.bf16.msra.mxu1 %v4127_v28  ;;  %2771 = vmatprep.subr.bf16.mxu0 %v4131_v14 }
  0x68   :  { %2803 = vmatprep.subr.bf16.mxu1 %v4133_v19 }
  0x6a   :  { %2773 = vmatpush1.bf16.msra.mxu0 %v4137_v60 }
  0x6b   :  { %2805 = vmatpush1.bf16.msra.mxu1 %v4139_v63  ;;  %2807 = vmatprep.subr.bf16.mxu0 %v3943_v7 }
  0x6c   :  { %2839 = vmatprep.subr.bf16.mxu1 %v3945_v11 }
  0xaa   :  { %v55_v9 = vpop.permute.xlu0 %54 }
  0xab   :  { %vm56_vm0 = vcmp.eq.s32.totalorder %v55_v9, %v4147_v55 }
  0xac   :  { %2653 = vmatmul.mubr.msk.f32.vlgmr.msra.gmra.mrb[0].mxu0 %vm56_vm0, %v4717_v10  ;;  %2654 = vmatmul.mubr.msk.f32.vlgmr.msra.gmra.mrb[0].mxu1 %vm56_vm0, %v4717_v10 }
  0xad   :  { %2809 = vmatpush1.bf16.msra.mxu0 %v3951_v16  ;;  %2841 = vmatpush1.bf16.msra.mxu1 %v3953_v17 }
  0xae   :  { %2811 = vmatprep.subr.bf16.mxu0 %v3956_v21  ;;  %2843 = vmatprep.subr.bf16.mxu1 %v3960_v25 }
  0xaf   :  { %556 = vmatprep.mubr.f32.mxu0 %v4789_v5  ;;  %627 = vmatprep.mubr.f32.mxu1 %v4789_v5 }
  0xb1   :  { %2813 = vmatpush1.bf16.msra.mxu0 %v3962_v26  ;;  %2845 = vmatpush1.bf16.msra.mxu1 %v3965_v30 }
  0xb2   :  { %2815 = vmatprep.subr.bf16.mxu0 %v3971_v35  ;;  %2847 = vmatprep.subr.bf16.mxu1 %v3973_v36 }
  0xb5   :  { %2817 = vmatpush1.bf16.msra.mxu0 %v3977_v43  ;;  %2849 = vmatpush1.bf16.msra.mxu1 %v3979_v44 }
  0xb6   :  { %2819 = vmatprep.subr.bf16.mxu0 %v3983_v48  ;;  %2851 = vmatprep.subr.bf16.mxu1 %v3985_v49 }
  0xb9   :  { %2821 = vmatpush1.bf16.msra.mxu0 %v3989_v57  ;;  %2853 = vmatpush1.bf16.msra.mxu1 %v3991_v58 }
  0xba   :  { %2823 = vmatprep.subr.bf16.mxu0 %v3995_v61  ;;  %2855 = vmatprep.subr.bf16.mxu1 %v3997_v62 }
  0xbd   :  { %2825 = vmatpush1.bf16.msra.mxu0 %v4001_v6  ;;  %2857 = vmatpush1.bf16.msra.mxu1 %v4003_v8 }
  0xbe   :  { %2827 = vmatprep.subr.bf16.mxu0 %v4007_v12  ;;  %2859 = vmatprep.subr.bf16.mxu1 %v4009_v13 }
  0xc1   :  { %2829 = vmatpush1.bf16.msra.mxu0 %v4013_v23  ;;  %2861 = vmatpush1.bf16.msra.mxu1 %v4015_v24 }
  0xc2   :  { %2831 = vmatprep.subr.bf16.mxu0 %v4019_v29  ;;  %2863 = vmatprep.subr.bf16.mxu1 %v4021_v31 }
  0xc5   :  { %2833 = vmatpush1.bf16.msra.mxu0 %v4025_v40  ;;  %2865 = vmatpush1.bf16.msra.mxu1 %v4027_v41 }
  0xc6   :  { %2835 = vmatprep.subr.bf16.mxu0 %v4031_v46  ;;  %2867 = vmatprep.subr.bf16.mxu1 %v4033_v47 }
  0xc9   :  { %2837 = vmatpush1.bf16.msra.mxu0 %v4037_v56  ;;  %2869 = vmatpush1.bf16.msra.mxu1 %v4039_v59 }
  0xca   :  { %2871 = vmatprep.subr.bf16.mxu0 %v4043_v0  ;;  %2903 = vmatprep.subr.bf16.mxu1 %v4045_v1 }
 0x17f   :  { %v394_v37 = vpop.f32.mrb[0].mxu0  ;;  %v465_v54 = vpop.f32.mrb[0].mxu1 }
 0x180   :  { %3743 = vtanh.f32 %v394_v37  ;;  %v396_v9 = vpop.f32.mrb[1].mxu0  ;;  %v467_v3 = vpop.f32.mrb[1].mxu1 }
 0x181   :  { %3745 = vtanh.f32 %v396_v9 }
 0x182   :  { %3747 = vtanh.f32 %v467_v3  ;;  %v489_v3 = vpop.permute.xlu0 %488 }
 0x183   :  { %3749 = vtanh.f32 %v465_v54  ;;  %v4799_v54 = vld [vmem:[#allocation38_spill] sm:$0xff]  ;;  %vm490_vm1 = vcmp.eq.s32.totalorder %v489_v3, %v4147_v55  ;;  %v4805_v3 = vld [vmem:[#allocation24_spill] sm:$0xff] }
 0x18a   :  { %v3744_v10 = vpop.eup %3743 }
 0x18b   :  { %v473_v1 = vadd.f32 1.0, %v3744_v10  ;;  %v3746_v34 = vpop.eup %3745  ;;  %v4798_v10 = vld [vmem:[#allocation37_spill] sm:$0xff] }
 0x18c   :  { %v474_v59 = vadd.f32 1.0, %v3746_v34  ;;  %v3748_v56 = vpop.eup %3747  ;;  %v4800_v34 = vmov 1.0  }
 0x18d   :  { %v476_v0 = vmul.f32 0.5, %v473_v1  ;;  %v3750_v45 = vpop.eup %3749  ;;  %v4797_v1 = vld [vmem:[#allocation36_spill] sm:$0xff] }
 0x18e   :  { %v477_v38 = vmul.f32 0.5, %v474_v59  ;;  %v475_v37 = vadd.f32 1.0, %v3750_v45  ;;  %v4795_v59 = vld [vmem:[#allocation34_spill] sm:$0xff]  ;;  %v4802_v45 = vld [vmem:[#allocation21_spill] sm:$0xff] }
 0x18f   :  { %v481_v47 = vmul.f32 %v3748_v56, %v476_v0  ;;  %v4794_v56 = vld [vmem:[#allocation33_spill] sm:$0xff]  ;;  %v4796_v0 = vld [vmem:[#allocation35_spill] sm:$0xff] }
 0x190   :  { %v480_v46 = vmul.f32 0.0, %v477_v38  ;;  %v478_v40 = vmul.f32 0.5, %v475_v37  ;;  %v4801_v38 = vld [vmem:[#allocation20_spill] sm:$0xff]  ;;  %v4803_v37 = vld [vmem:[#allocation22_spill] sm:$0xff] }
 0x192   :  { %v4198_v41 = vadd.f32 %v481_v47, %v480_v46  ;;  %v4792_v46 = vld [vmem:[#allocation31_spill] sm:$0xff]  ;;  %v4793_v47 = vld [vmem:[#allocation32_spill] sm:$0xff] }
 0x194   :  { %3751 = vtanh.f32 %v4198_v41 }
 0x19e   :  { %v3752_v31 = vpop.eup %3751 }
 0x19f   :  { %v484_v9 = vmul.f32 %v3752_v31, %v478_v40  ;;  %v4790_v31 = vld [vmem:[#allocation29_spill] sm:$0xff]  ;;  %v4791_v40 = vld [vmem:[#allocation30_spill] sm:$0xff] }
 0x1a1   :  { %557 = vmatmul.mubr.f32.vlgmr.msra.gmra.mrb[2].mxu0 %v484_v9  ;;  %628 = vmatmul.mubr.f32.vlgmr.msra.gmra.mrb[2].mxu1 %v484_v9  ;;  %v4804_v9 = vld [vmem:[#allocation23_spill] sm:$0xff] }
 0x1a2   :  { %2873 = vmatpush1.bf16.msra.mxu0 %v4049_v15  ;;  %2905 = vmatpush1.bf16.msra.mxu1 %v4051_v18 }
 0x1a3   :  { %2875 = vmatprep.subr.bf16.mxu0 %v4055_v22  ;;  %2907 = vmatprep.subr.bf16.mxu1 %v4057_v27 }
 0x1a4   :  { %698 = vmatprep.mubr.f32.mxu0 %v4789_v5  ;;  %769 = vmatprep.mubr.f32.mxu1 %v4789_v5 }
 0x1a6   :  { %2877 = vmatpush1.bf16.msra.mxu0 %v4063_v39  ;;  %2909 = vmatpush1.bf16.msra.mxu1 %v4065_v42 }
 0x1a7   :  { %2879 = vmatprep.subr.bf16.mxu0 %v4069_v51  ;;  %2911 = vmatprep.subr.bf16.mxu1 %v4071_v52 }
 0x1aa   :  { %2881 = vmatpush1.bf16.msra.mxu0 %v4790_v31  ;;  %2913 = vmatpush1.bf16.msra.mxu1 %v4791_v40 }
 0x1ab   :  { %2883 = vmatprep.subr.bf16.mxu0 %v4792_v46  ;;  %2915 = vmatprep.subr.bf16.mxu1 %v4793_v47 }
 0x1ae   :  { %2885 = vmatpush1.bf16.msra.mxu0 %v4794_v56  ;;  %2917 = vmatpush1.bf16.msra.mxu1 %v4795_v59 }
 0x1af   :  { %2887 = vmatprep.subr.bf16.mxu0 %v4796_v0  ;;  %2919 = vmatprep.subr.bf16.mxu1 %v4797_v1 }
 0x1b2   :  { %2889 = vmatpush1.bf16.msra.mxu0 %v4798_v10  ;;  %2921 = vmatpush1.bf16.msra.mxu1 %v4799_v54 }
 0x1b3   :  { %2891 = vmatprep.subr.bf16.mxu0 %v4107_v32  ;;  %2923 = vmatprep.subr.bf16.mxu1 %v4109_v33 }
 0x1b6   :  { %2893 = vmatpush1.bf16.msra.mxu0 %v4113_v50  ;;  %2925 = vmatpush1.bf16.msra.mxu1 %v4115_v53 }
 0x1b7   :  { %2895 = vmatprep.subr.bf16.mxu0 %v4119_v2  ;;  %2927 = vmatprep.subr.bf16.mxu1 %v4121_v4 }
 0x1ba   :  { %2897 = vmatpush1.bf16.msra.mxu0 %v4125_v20  ;;  %2929 = vmatpush1.bf16.msra.mxu1 %v4127_v28 }
 0x1bb   :  { %2899 = vmatprep.subr.bf16.mxu0 %v4131_v14  ;;  %2931 = vmatprep.subr.bf16.mxu1 %v4133_v19 }
 0x1be   :  { %2901 = vmatpush1.bf16.msra.mxu0 %v4137_v60  ;;  %2933 = vmatpush1.bf16.msra.mxu1 %v4139_v63 }
 0x1bf   :  { %2935 = vmatprep.subr.bf16.mxu0 %v3943_v7  ;;  %2967 = vmatprep.subr.bf16.mxu1 %v3945_v11 }
 0x1c1   :  { %2656 = vmatmul.mubr.msk.f32.vlgmr.msra.gmra.mrb[2].mxu0 %vm490_vm1, %v4800_v34  ;;  %2657 = vmatmul.mubr.msk.f32.vlgmr.msra.gmra.mrb[2].mxu1 %vm490_vm1, %v4800_v34 }
 0x1c2   :  { %2937 = vmatpush1.bf16.msra.mxu0 %v3951_v16  ;;  %2969 = vmatpush1.bf16.msra.mxu1 %v3953_v17 }
 0x1c3   :  { %2939 = vmatprep.subr.bf16.mxu0 %v3956_v21  ;;  %2971 = vmatprep.subr.bf16.mxu1 %v3960_v25 }
 0x1c4   :  { %862 = vmatprep.mubr.f32.mxu0 %v4789_v5  ;;  %933 = vmatprep.mubr.f32.mxu1 %v4789_v5 }
 0x1c6   :  { %2941 = vmatpush1.bf16.msra.mxu0 %v3962_v26  ;;  %2973 = vmatpush1.bf16.msra.mxu1 %v3965_v30 }
 0x1c7   :  { %2943 = vmatprep.subr.bf16.mxu0 %v3971_v35  ;;  %2975 = vmatprep.subr.bf16.mxu1 %v3973_v36 }
 0x1ca   :  { %2945 = vmatpush1.bf16.msra.mxu0 %v3977_v43  ;;  %2977 = vmatpush1.bf16.msra.mxu1 %v3979_v44 }
 0x1cb   :  { %2947 = vmatprep.subr.bf16.mxu0 %v3983_v48  ;;  %2979 = vmatprep.subr.bf16.mxu1 %v3985_v49 }
 0x1ce   :  { %2949 = vmatpush1.bf16.msra.mxu0 %v3989_v57  ;;  %2981 = vmatpush1.bf16.msra.mxu1 %v3991_v58 }
 0x1cf   :  { %2951 = vmatprep.subr.bf16.mxu0 %v3995_v61  ;;  %2983 = vmatprep.subr.bf16.mxu1 %v3997_v62 }
 0x1d2   :  { %2953 = vmatpush1.bf16.msra.mxu0 %v4001_v6  ;;  %2985 = vmatpush1.bf16.msra.mxu1 %v4003_v8  ;;  %v4806_v8 = vld [vmem:[#allocation25_spill] sm:$0xff] }
 0x1d3   :  { %2955 = vmatprep.subr.bf16.mxu0 %v4007_v12  ;;  %2987 = vmatprep.subr.bf16.mxu1 %v4009_v13  ;;  %v4807_v12 = vld [vmem:[#allocation26_spill] sm:$0xff]  ;;  %v4808_v13 = vld [vmem:[#allocation27_spill] sm:$0xff] }
 0x1d6   :  { %2957 = vmatpush1.bf16.msra.mxu0 %v4013_v23  ;;  %2989 = vmatpush1.bf16.msra.mxu1 %v4015_v24  ;;  %v4809_v23 = vld [vmem:[#allocation28_spill] sm:$0xff] }
 0x1d7   :  { %2959 = vmatprep.subr.bf16.mxu0 %v4019_v29  ;;  %2991 = vmatprep.subr.bf16.mxu1 %v4801_v38 }
 0x1da   :  { %2961 = vmatpush1.bf16.msra.mxu0 %v4802_v45  ;;  %2993 = vmatpush1.bf16.msra.mxu1 %v4803_v37 }
 0x1db   :  { %2963 = vmatprep.subr.bf16.mxu0 %v4804_v9  ;;  %2995 = vmatprep.subr.bf16.mxu1 %v4805_v3 }
 0x1de   :  { %2965 = vmatpush1.bf16.msra.mxu0 %v4806_v8  ;;  %2997 = vmatpush1.bf16.msra.mxu1 %v4807_v12 }
 0x1df   :  { %2999 = vmatprep.subr.bf16.mxu0 %v4808_v13  ;;  %3031 = vmatprep.subr.bf16.mxu1 %v4809_v23 }
 0x294   :  { %v700_v24 = vpop.f32.mrb[2].mxu0  ;;  %v771_v29 = vpop.f32.mrb[2].mxu1 }
 0x295   :  { %3753 = vtanh.f32 %v700_v24  ;;  %v702_v38 = vpop.f32.mrb[3].mxu0  ;;  %v773_v6 = vpop.f32.mrb[3].mxu1 }
 0x296   :  { %3755 = vtanh.f32 %v702_v38 }
 0x297   :  { %3757 = vtanh.f32 %v773_v6 }
 0x298   :  { %3759 = vtanh.f32 %v771_v29  ;;  %v4816_v29 = vld [vmem:[#allocation15_spill] sm:$0xff] }
 0x29f   :  { %v3754_v37 = vpop.eup %3753 }
 0x2a0   :  { %v779_v45 = vadd.f32 1.0, %v3754_v37  ;;  %v3756_v9 = vpop.eup %3755  ;;  %v4819_v37 = vld [vmem:[#allocation18_spill] sm:$0xff] }
 0x2a1   :  { %v780_v3 = vadd.f32 1.0, %v3756_v9  ;;  %v3758_v8 = vpop.eup %3757  ;;  %v4820_v9 = vld [vmem:[#allocation19_spill] sm:$0xff] }
 0x2a2   :  { %v782_v62 = vmul.f32 0.5, %v779_v45  ;;  %v3760_v24 = vpop.eup %3759  ;;  %v4818_v45 = vld [vmem:[#allocation17_spill] sm:$0xff] }
 0x2a3   :  { %v783_v61 = vmul.f32 0.5, %v780_v3  ;;  %v781_v23 = vadd.f32 1.0, %v3760_v24  ;;  %v4821_v3 = vld [vmem:[#allocation20_spill] sm:$0xff]  ;;  %v4822_v24 = vld [vmem:[#allocation21_spill] sm:$0xff] }
 0x2a4   :  { %v787_v12 = vmul.f32 %v3758_v8, %v782_v62  ;;  %v4811_v62 = vld [vmem:[#allocation10_spill] sm:$0xff]  ;;  %v4812_v8 = vld [vmem:[#allocation11_spill] sm:$0xff] }
 0x2a5   :  { %v786_v13 = vmul.f32 %v783_v61, %v4198_v41  ;;  %v784_v57 = vmul.f32 0.5, %v781_v23  ;;  %v4810_v61 = vld [vmem:[#allocation9_spill] sm:$0xff]  ;;  %v4815_v23 = vld [vmem:[#allocation14_spill] sm:$0xff]  ;;  %v4817_v41 = vld [vmem:[#allocation16_spill] sm:$0xff] }
 0x2a7   :  { %v4273_v58 = vadd.f32 %v787_v12, %v786_v13  ;;  %v4813_v12 = vld [vmem:[#allocation12_spill] sm:$0xff]  ;;  %v4814_v13 = vld [vmem:[#allocation13_spill] sm:$0xff] }
 0x2a9   :  { %3761 = vtanh.f32 %v4273_v58 }
 0x2b3   :  { %v3762_v38 = vpop.eup %3761 }
 0x2b4   :  { %v790_v6 = vmul.f32 %v3762_v38, %v784_v57  ;;  %v795_v57 = vpop.permute.xlu1 %794  ;;  %v4823_v38 = vld [vmem:[#allocation22_spill] sm:$0xff] }
 0x2b5   :  { %vm796_vm2 = vcmp.eq.s32.totalorder %v795_v57, %v4147_v55  ;;  %v4825_v57 = vld [vmem:[#allocation24_spill] sm:$0xff] }
 0x2b6   :  { %863 = vmatmul.mubr.f32.vlgmr.msra.gmra.mrb[4].mxu0 %v790_v6  ;;  %934 = vmatmul.mubr.f32.vlgmr.msra.gmra.mrb[4].mxu1 %v790_v6  ;;  %v4824_v6 = vld [vmem:[#allocation23_spill] sm:$0xff] }
 0x2b7   :  { %3001 = vmatpush1.bf16.msra.mxu0 %v4049_v15  ;;  %3033 = vmatpush1.bf16.msra.mxu1 %v4051_v18 }
 0x2b8   :  { %3003 = vmatprep.subr.bf16.mxu0 %v4055_v22  ;;  %3035 = vmatprep.subr.bf16.mxu1 %v4057_v27 }
 0x2b9   :  { %1004 = vmatprep.mubr.f32.mxu0 %v4789_v5  ;;  %1075 = vmatprep.mubr.f32.mxu1 %v4789_v5 }
 0x2bb   :  { %3005 = vmatpush1.bf16.msra.mxu0 %v4063_v39  ;;  %3037 = vmatpush1.bf16.msra.mxu1 %v4065_v42 }
 0x2bc   :  { %3007 = vmatprep.subr.bf16.mxu0 %v4069_v51  ;;  %3039 = vmatprep.subr.bf16.mxu1 %v4071_v52 }
 0x2bf   :  { %3009 = vmatpush1.bf16.msra.mxu0 %v4790_v31  ;;  %3041 = vmatpush1.bf16.msra.mxu1 %v4791_v40 }
 0x2c0   :  { %3011 = vmatprep.subr.bf16.mxu0 %v4792_v46  ;;  %3043 = vmatprep.subr.bf16.mxu1 %v4793_v47 }
 0x2c3   :  { %3013 = vmatpush1.bf16.msra.mxu0 %v4794_v56  ;;  %3045 = vmatpush1.bf16.msra.mxu1 %v4795_v59 }
 0x2c4   :  { %3015 = vmatprep.subr.bf16.mxu0 %v4796_v0  ;;  %3047 = vmatprep.subr.bf16.mxu1 %v4797_v1 }
 0x2c7   :  { %3017 = vmatpush1.bf16.msra.mxu0 %v4798_v10  ;;  %3049 = vmatpush1.bf16.msra.mxu1 %v4799_v54 }
 0x2c8   :  { %3019 = vmatprep.subr.bf16.mxu0 %v4107_v32  ;;  %3051 = vmatprep.subr.bf16.mxu1 %v4109_v33 }
 0x2cb   :  { %3021 = vmatpush1.bf16.msra.mxu0 %v4113_v50  ;;  %3053 = vmatpush1.bf16.msra.mxu1 %v4115_v53 }
 0x2cc   :  { %3023 = vmatprep.subr.bf16.mxu0 %v4119_v2  ;;  %3055 = vmatprep.subr.bf16.mxu1 %v4121_v4 }
 0x2cf   :  { %3025 = vmatpush1.bf16.msra.mxu0 %v4125_v20  ;;  %3057 = vmatpush1.bf16.msra.mxu1 %v4127_v28 }
 0x2d0   :  { %3027 = vmatprep.subr.bf16.mxu0 %v4131_v14  ;;  %3059 = vmatprep.subr.bf16.mxu1 %v4133_v19 }
 0x2d3   :  { %3029 = vmatpush1.bf16.msra.mxu0 %v4137_v60  ;;  %3061 = vmatpush1.bf16.msra.mxu1 %v4139_v63 }
 0x2d4   :  { %3063 = vmatprep.subr.bf16.mxu0 %v3943_v7  ;;  %3095 = vmatprep.subr.bf16.mxu1 %v3945_v11 }
 0x2d6   :  { %2659 = vmatmul.mubr.msk.f32.vlgmr.msra.gmra.mrb[4].mxu0 %vm796_vm2, %v4800_v34  ;;  %2660 = vmatmul.mubr.msk.f32.vlgmr.msra.gmra.mrb[4].mxu1 %vm796_vm2, %v4800_v34 }
 0x2d7   :  { %3065 = vmatpush1.bf16.msra.mxu0 %v3951_v16  ;;  %3097 = vmatpush1.bf16.msra.mxu1 %v3953_v17 }
 0x2d8   :  { %3067 = vmatprep.subr.bf16.mxu0 %v3956_v21  ;;  %3099 = vmatprep.subr.bf16.mxu1 %v3960_v25 }
 0x2d9   :  { %1168 = vmatprep.mubr.f32.mxu0 %v4789_v5  ;;  %1239 = vmatprep.mubr.f32.mxu1 %v4789_v5 }
 0x2db   :  { %3069 = vmatpush1.bf16.msra.mxu0 %v3962_v26  ;;  %3101 = vmatpush1.bf16.msra.mxu1 %v3965_v30 }
 0x2dc   :  { %3071 = vmatprep.subr.bf16.mxu0 %v3971_v35  ;;  %3103 = vmatprep.subr.bf16.mxu1 %v3973_v36 }
 0x2df   :  { %3073 = vmatpush1.bf16.msra.mxu0 %v3977_v43  ;;  %3105 = vmatpush1.bf16.msra.mxu1 %v3979_v44 }
 0x2e0   :  { %3075 = vmatprep.subr.bf16.mxu0 %v3983_v48  ;;  %3107 = vmatprep.subr.bf16.mxu1 %v3985_v49 }
 0x2e3   :  { %3077 = vmatpush1.bf16.msra.mxu0 %v4810_v61  ;;  %3109 = vmatpush1.bf16.msra.mxu1 %v4811_v62 }
 0x2e4   :  { %3079 = vmatprep.subr.bf16.mxu0 %v4812_v8  ;;  %3111 = vmatprep.subr.bf16.mxu1 %v4813_v12 }
 0x2e7   :  { %3081 = vmatpush1.bf16.msra.mxu0 %v4814_v13  ;;  %3113 = vmatpush1.bf16.msra.mxu1 %v4815_v23  ;;  %v4826_v23 = vld [vmem:[#allocation25_spill] sm:$0xff] }
 0x2e8   :  { %3083 = vmatprep.subr.bf16.mxu0 %v4816_v29  ;;  %3115 = vmatprep.subr.bf16.mxu1 %v4817_v41  ;;  %v4827_v29 = vld [vmem:[#allocation26_spill] sm:$0xff]  ;;  %v4828_v41 = vld [vmem:[#allocation27_spill] sm:$0xff] }
 0x2eb   :  { %3085 = vmatpush1.bf16.msra.mxu0 %v4818_v45  ;;  %3117 = vmatpush1.bf16.msra.mxu1 %v4819_v37  ;;  %v4829_v45 = vld [vmem:[#allocation28_spill] sm:$0xff] }
 0x2ec   :  { %3087 = vmatprep.subr.bf16.mxu0 %v4820_v9  ;;  %3119 = vmatprep.subr.bf16.mxu1 %v4821_v3 }
 0x2ef   :  { %3089 = vmatpush1.bf16.msra.mxu0 %v4822_v24  ;;  %3121 = vmatpush1.bf16.msra.mxu1 %v4823_v38 }
 0x2f0   :  { %3091 = vmatprep.subr.bf16.mxu0 %v4824_v6  ;;  %3123 = vmatprep.subr.bf16.mxu1 %v4825_v57 }
 0x2f3   :  { %3093 = vmatpush1.bf16.msra.mxu0 %v4826_v23  ;;  %3125 = vmatpush1.bf16.msra.mxu1 %v4827_v29 }
 0x2f4   :  { %3127 = vmatprep.subr.bf16.mxu0 %v4828_v41  ;;  %3159 = vmatprep.subr.bf16.mxu1 %v4829_v45 }
 0x3a9   :  { %v1006_v37 = vpop.f32.mrb[4].mxu0  ;;  %v1077_v9 = vpop.f32.mrb[4].mxu1 }
 0x3aa   :  { %3763 = vtanh.f32 %v1006_v37  ;;  %v1008_v3 = vpop.f32.mrb[5].mxu0  ;;  %v1079_v13 = vpop.f32.mrb[5].mxu1 }
 0x3ab   :  { %3765 = vtanh.f32 %v1008_v3 }
 0x3ac   :  { %3767 = vtanh.f32 %v1079_v13 }
 0x3ad   :  { %3769 = vtanh.f32 %v1077_v9  ;;  %v4837_v9 = vld [vmem:[#allocation16_spill] sm:$0xff] }
 0x3b4   :  { %v3764_v38 = vpop.eup %3763 }
 0x3b5   :  { %v1085_v24 = vadd.f32 1.0, %v3764_v38  ;;  %v3766_v6 = vpop.eup %3765  ;;  %v4839_v38 = vld [vmem:[#allocation18_spill] sm:$0xff] }
 0x3b6   :  { %v1086_v57 = vadd.f32 1.0, %v3766_v6  ;;  %v3768_v23 = vpop.eup %3767  ;;  %v4840_v6 = vld [vmem:[#allocation19_spill] sm:$0xff] }
 0x3b7   :  { %v1088_v12 = vmul.f32 0.5, %v1085_v24  ;;  %v3770_v37 = vpop.eup %3769  ;;  %v4838_v24 = vld [vmem:[#allocation17_spill] sm:$0xff] }
 0x3b8   :  { %v1089_v8 = vmul.f32 0.5, %v1086_v57  ;;  %v1087_v45 = vadd.f32 1.0, %v3770_v37  ;;  %v4841_v57 = vld [vmem:[#allocation20_spill] sm:$0xff]  ;;  %v4842_v37 = vld [vmem:[#allocation21_spill] sm:$0xff] }
 0x3b9   :  { %v1093_v29 = vmul.f32 %v3768_v23, %v1088_v12  ;;  %v4832_v12 = vld [vmem:[#allocation11_spill] sm:$0xff]  ;;  %v4833_v23 = vld [vmem:[#allocation12_spill] sm:$0xff] }
 0x3ba   :  { %v1092_v41 = vmul.f32 %v1089_v8, %v4273_v58  ;;  %v1090_v61 = vmul.f32 0.5, %v1087_v45  ;;  %v1101_v58 = vpop.permute.xlu1 %1100  ;;  %v4831_v8 = vld [vmem:[#allocation10_spill] sm:$0xff]  ;;  %v4836_v45 = vld [vmem:[#allocation15_spill] sm:$0xff] }
 0x3bb   :  { %vm1102_vm3 = vcmp.eq.s32.totalorder %v1101_v58, %v4147_v55  ;;  %v4845_v58 = vld [vmem:[#allocation24_spill] sm:$0xff] }
 0x3bc   :  { %v4348_v62 = vadd.f32 %v1093_v29, %v1092_v41  ;;  %v4834_v29 = vld [vmem:[#allocation13_spill] sm:$0xff]  ;;  %v4835_v41 = vld [vmem:[#allocation14_spill] sm:$0xff] }
 0x3be   :  { %3771 = vtanh.f32 %v4348_v62 }
 0x3c8   :  { %v3772_v3 = vpop.eup %3771 }
 0x3c9   :  { %v1096_v13 = vmul.f32 %v3772_v3, %v1090_v61  ;;  %v4830_v61 = vld [vmem:[#allocation9_spill] sm:$0xff]  ;;  %v4843_v3 = vld [vmem:[#allocation22_spill] sm:$0xff] }
 0x3cb   :  { %1169 = vmatmul.mubr.f32.vlgmr.msra.gmra.mrb[6].mxu0 %v1096_v13  ;;  %1240 = vmatmul.mubr.f32.vlgmr.msra.gmra.mrb[6].mxu1 %v1096_v13  ;;  %v4844_v13 = vld [vmem:[#allocation23_spill] sm:$0xff] }
 0x3cc   :  { %3129 = vmatpush1.bf16.msra.mxu0 %v4049_v15  ;;  %3161 = vmatpush1.bf16.msra.mxu1 %v4051_v18 }
 0x3cd   :  { %3131 = vmatprep.subr.bf16.mxu0 %v4055_v22  ;;  %3163 = vmatprep.subr.bf16.mxu1 %v4057_v27 }
 0x3ce   :  { %1310 = vmatprep.mubr.f32.mxu0 %v4789_v5  ;;  %1381 = vmatprep.mubr.f32.mxu1 %v4789_v5 }
 0x3d0   :  { %3133 = vmatpush1.bf16.msra.mxu0 %v4063_v39  ;;  %3165 = vmatpush1.bf16.msra.mxu1 %v4065_v42 }
 0x3d1   :  { %3135 = vmatprep.subr.bf16.mxu0 %v4069_v51  ;;  %3167 = vmatprep.subr.bf16.mxu1 %v4071_v52 }
 0x3d4   :  { %3137 = vmatpush1.bf16.msra.mxu0 %v4790_v31  ;;  %3169 = vmatpush1.bf16.msra.mxu1 %v4791_v40 }
 0x3d5   :  { %3139 = vmatprep.subr.bf16.mxu0 %v4792_v46  ;;  %3171 = vmatprep.subr.bf16.mxu1 %v4793_v47 }
 0x3d8   :  { %3141 = vmatpush1.bf16.msra.mxu0 %v4794_v56  ;;  %3173 = vmatpush1.bf16.msra.mxu1 %v4795_v59 }
 0x3d9   :  { %3143 = vmatprep.subr.bf16.mxu0 %v4796_v0  ;;  %3175 = vmatprep.subr.bf16.mxu1 %v4797_v1 }
 0x3dc   :  { %3145 = vmatpush1.bf16.msra.mxu0 %v4798_v10  ;;  %3177 = vmatpush1.bf16.msra.mxu1 %v4799_v54 }
 0x3dd   :  { %3147 = vmatprep.subr.bf16.mxu0 %v4107_v32  ;;  %3179 = vmatprep.subr.bf16.mxu1 %v4109_v33 }
 0x3e0   :  { %3149 = vmatpush1.bf16.msra.mxu0 %v4113_v50  ;;  %3181 = vmatpush1.bf16.msra.mxu1 %v4115_v53 }
 0x3e1   :  { %3151 = vmatprep.subr.bf16.mxu0 %v4119_v2  ;;  %3183 = vmatprep.subr.bf16.mxu1 %v4121_v4 }
 0x3e4   :  { %3153 = vmatpush1.bf16.msra.mxu0 %v4125_v20  ;;  %3185 = vmatpush1.bf16.msra.mxu1 %v4127_v28 }
 0x3e5   :  { %3155 = vmatprep.subr.bf16.mxu0 %v4131_v14  ;;  %3187 = vmatprep.subr.bf16.mxu1 %v4133_v19 }
 0x3e8   :  { %3157 = vmatpush1.bf16.msra.mxu0 %v4137_v60  ;;  %3189 = vmatpush1.bf16.msra.mxu1 %v4139_v63 }
 0x3e9   :  { %3191 = vmatprep.subr.bf16.mxu0 %v3943_v7  ;;  %3223 = vmatprep.subr.bf16.mxu1 %v3945_v11 }
 0x3eb   :  { %2662 = vmatmul.mubr.msk.f32.vlgmr.msra.gmra.mrb[6].mxu0 %vm1102_vm3, %v4800_v34  ;;  %2663 = vmatmul.mubr.msk.f32.vlgmr.msra.gmra.mrb[6].mxu1 %vm1102_vm3, %v4800_v34 }
 0x3ec   :  { %3193 = vmatpush1.bf16.msra.mxu0 %v3951_v16  ;;  %3225 = vmatpush1.bf16.msra.mxu1 %v3953_v17 }
 0x3ed   :  { %3195 = vmatprep.subr.bf16.mxu0 %v3956_v21  ;;  %3227 = vmatprep.subr.bf16.mxu1 %v3960_v25 }
 0x3ee   :  { %1474 = vmatprep.mubr.f32.mxu0 %v4789_v5  ;;  %1545 = vmatprep.mubr.f32.mxu1 %v4789_v5 }
 0x3f0   :  { %3197 = vmatpush1.bf16.msra.mxu0 %v3962_v26  ;;  %3229 = vmatpush1.bf16.msra.mxu1 %v3965_v30 }
 0x3f1   :  { %3199 = vmatprep.subr.bf16.mxu0 %v3971_v35  ;;  %3231 = vmatprep.subr.bf16.mxu1 %v3973_v36 }
 0x3f4   :  { %3201 = vmatpush1.bf16.msra.mxu0 %v3977_v43  ;;  %3233 = vmatpush1.bf16.msra.mxu1 %v3979_v44 }
 0x3f5   :  { %3203 = vmatprep.subr.bf16.mxu0 %v3983_v48  ;;  %3235 = vmatprep.subr.bf16.mxu1 %v3985_v49 }
 0x3f8   :  { %3205 = vmatpush1.bf16.msra.mxu0 %v4830_v61  ;;  %3237 = vmatpush1.bf16.msra.mxu1 %v4831_v8 }
 0x3f9   :  { %3207 = vmatprep.subr.bf16.mxu0 %v4832_v12  ;;  %3239 = vmatprep.subr.bf16.mxu1 %v4833_v23 }
 0x3fc   :  { %3209 = vmatpush1.bf16.msra.mxu0 %v4834_v29  ;;  %3241 = vmatpush1.bf16.msra.mxu1 %v4835_v41  ;;  %v4846_v41 = vld [vmem:[#allocation25_spill] sm:$0xff] }
 0x3fd   :  { %3211 = vmatprep.subr.bf16.mxu0 %v4836_v45  ;;  %3243 = vmatprep.subr.bf16.mxu1 %v4837_v9  ;;  %v4847_v45 = vld [vmem:[#allocation26_spill] sm:$0xff]  ;;  %v4848_v9 = vld [vmem:[#allocation27_spill] sm:$0xff] }
 0x400   :  { %3213 = vmatpush1.bf16.msra.mxu0 %v4838_v24  ;;  %3245 = vmatpush1.bf16.msra.mxu1 %v4839_v38  ;;  %v4849_v24 = vld [vmem:[#allocation28_spill] sm:$0xff] }
 0x401   :  { %3215 = vmatprep.subr.bf16.mxu0 %v4840_v6  ;;  %3247 = vmatprep.subr.bf16.mxu1 %v4841_v57 }
 0x404   :  { %3217 = vmatpush1.bf16.msra.mxu0 %v4842_v37  ;;  %3249 = vmatpush1.bf16.msra.mxu1 %v4843_v3 }
 0x405   :  { %3219 = vmatprep.subr.bf16.mxu0 %v4844_v13  ;;  %3251 = vmatprep.subr.bf16.mxu1 %v4845_v58 }
 0x408   :  { %3221 = vmatpush1.bf16.msra.mxu0 %v4846_v41  ;;  %3253 = vmatpush1.bf16.msra.mxu1 %v4847_v45 }
 0x409   :  { %3255 = vmatprep.subr.bf16.mxu0 %v4848_v9  ;;  %3287 = vmatprep.subr.bf16.mxu1 %v4849_v24 }
 0x4be   :  { %v1312_v38 = vpop.f32.mrb[6].mxu0  ;;  %v1383_v6 = vpop.f32.mrb[6].mxu1 }
 0x4bf   :  { %3773 = vtanh.f32 %v1312_v38  ;;  %v1314_v57 = vpop.f32.mrb[7].mxu0  ;;  %v1385_v29 = vpop.f32.mrb[7].mxu1 }
 0x4c0   :  { %3775 = vtanh.f32 %v1314_v57 }
 0x4c1   :  { %3777 = vtanh.f32 %v1385_v29 }
 0x4c2   :  { %3779 = vtanh.f32 %v1383_v6  ;;  %v4857_v6 = vld [vmem:[#allocation16_spill] sm:$0xff] }
 0x4c9   :  { %v3774_v3 = vpop.eup %3773 }
 0x4ca   :  { %v1391_v37 = vadd.f32 1.0, %v3774_v3  ;;  %v3776_v13 = vpop.eup %3775  ;;  %v4859_v3 = vld [vmem:[#allocation18_spill] sm:$0xff] }
 0x4cb   :  { %v1392_v58 = vadd.f32 1.0, %v3776_v13  ;;  %v3778_v41 = vpop.eup %3777  ;;  %v4860_v13 = vld [vmem:[#allocation19_spill] sm:$0xff] }
 0x4cc   :  { %v1394_v23 = vmul.f32 0.5, %v1391_v37  ;;  %v3780_v38 = vpop.eup %3779  ;;  %v4858_v37 = vld [vmem:[#allocation17_spill] sm:$0xff] }
 0x4cd   :  { %v1395_v12 = vmul.f32 0.5, %v1392_v58  ;;  %v1393_v24 = vadd.f32 1.0, %v3780_v38  ;;  %v4861_v58 = vld [vmem:[#allocation20_spill] sm:$0xff]  ;;  %v4862_v38 = vld [vmem:[#allocation21_spill] sm:$0xff] }
 0x4ce   :  { %v1399_v45 = vmul.f32 %v3778_v41, %v1394_v23  ;;  %v4852_v23 = vld [vmem:[#allocation11_spill] sm:$0xff]  ;;  %v4853_v41 = vld [vmem:[#allocation12_spill] sm:$0xff] }
 0x4cf   :  { %v1398_v9 = vmul.f32 %v1395_v12, %v4348_v62  ;;  %v1396_v61 = vmul.f32 0.5, %v1393_v24  ;;  %v1407_v62 = vpop.permute.xlu0 %1406  ;;  %v4851_v12 = vld [vmem:[#allocation10_spill] sm:$0xff]  ;;  %v4856_v24 = vld [vmem:[#allocation15_spill] sm:$0xff] }
 0x4d0   :  { %vm1408_vm4 = vcmp.eq.s32.totalorder %v1407_v62, %v4147_v55  ;;  %v4865_v62 = vld [vmem:[#allocation24_spill] sm:$0xff] }
 0x4d1   :  { %v4423_v8 = vadd.f32 %v1399_v45, %v1398_v9  ;;  %v4854_v45 = vld [vmem:[#allocation13_spill] sm:$0xff]  ;;  %v4855_v9 = vld [vmem:[#allocation14_spill] sm:$0xff] }
 0x4d3   :  { %3781 = vtanh.f32 %v4423_v8 }
 0x4dd   :  { %v3782_v57 = vpop.eup %3781 }
 0x4de   :  { %v1402_v29 = vmul.f32 %v3782_v57, %v1396_v61  ;;  %v4850_v61 = vld [vmem:[#allocation9_spill] sm:$0xff]  ;;  %v4863_v57 = vld [vmem:[#allocation22_spill] sm:$0xff] }
 0x4e0   :  { %1475 = vmatmul.mubr.f32.vlgmr.msra.gmra.mrb[8].mxu0 %v1402_v29  ;;  %1546 = vmatmul.mubr.f32.vlgmr.msra.gmra.mrb[8].mxu1 %v1402_v29  ;;  %v4864_v29 = vld [vmem:[#allocation23_spill] sm:$0xff] }
 0x4e1   :  { %3257 = vmatpush1.bf16.msra.mxu0 %v4049_v15  ;;  %3289 = vmatpush1.bf16.msra.mxu1 %v4051_v18 }
 0x4e2   :  { %3259 = vmatprep.subr.bf16.mxu0 %v4055_v22  ;;  %3291 = vmatprep.subr.bf16.mxu1 %v4057_v27 }
 0x4e3   :  { %1616 = vmatprep.mubr.f32.mxu0 %v4789_v5  ;;  %1687 = vmatprep.mubr.f32.mxu1 %v4789_v5 }
 0x4e5   :  { %3261 = vmatpush1.bf16.msra.mxu0 %v4063_v39  ;;  %3293 = vmatpush1.bf16.msra.mxu1 %v4065_v42 }
 0x4e6   :  { %3263 = vmatprep.subr.bf16.mxu0 %v4069_v51  ;;  %3295 = vmatprep.subr.bf16.mxu1 %v4071_v52 }
 0x4e9   :  { %3265 = vmatpush1.bf16.msra.mxu0 %v4790_v31  ;;  %3297 = vmatpush1.bf16.msra.mxu1 %v4791_v40 }
 0x4ea   :  { %3267 = vmatprep.subr.bf16.mxu0 %v4792_v46  ;;  %3299 = vmatprep.subr.bf16.mxu1 %v4793_v47 }
 0x4ed   :  { %3269 = vmatpush1.bf16.msra.mxu0 %v4794_v56  ;;  %3301 = vmatpush1.bf16.msra.mxu1 %v4795_v59 }
 0x4ee   :  { %3271 = vmatprep.subr.bf16.mxu0 %v4796_v0  ;;  %3303 = vmatprep.subr.bf16.mxu1 %v4797_v1 }
 0x4f1   :  { %3273 = vmatpush1.bf16.msra.mxu0 %v4798_v10  ;;  %3305 = vmatpush1.bf16.msra.mxu1 %v4799_v54 }
 0x4f2   :  { %3275 = vmatprep.subr.bf16.mxu0 %v4107_v32  ;;  %3307 = vmatprep.subr.bf16.mxu1 %v4109_v33 }
 0x4f5   :  { %3277 = vmatpush1.bf16.msra.mxu0 %v4113_v50  ;;  %3309 = vmatpush1.bf16.msra.mxu1 %v4115_v53 }
 0x4f6   :  { %3279 = vmatprep.subr.bf16.mxu0 %v4119_v2  ;;  %3311 = vmatprep.subr.bf16.mxu1 %v4121_v4 }
 0x4f9   :  { %3281 = vmatpush1.bf16.msra.mxu0 %v4125_v20  ;;  %3313 = vmatpush1.bf16.msra.mxu1 %v4127_v28 }
 0x4fa   :  { %3283 = vmatprep.subr.bf16.mxu0 %v4131_v14  ;;  %3315 = vmatprep.subr.bf16.mxu1 %v4133_v19 }
 0x4fd   :  { %3285 = vmatpush1.bf16.msra.mxu0 %v4137_v60  ;;  %3317 = vmatpush1.bf16.msra.mxu1 %v4139_v63 }
 0x4fe   :  { %3319 = vmatprep.subr.bf16.mxu0 %v3943_v7  ;;  %3351 = vmatprep.subr.bf16.mxu1 %v3945_v11 }
 0x500   :  { %2665 = vmatmul.mubr.msk.f32.vlgmr.msra.gmra.mrb[8].mxu0 %vm1408_vm4, %v4800_v34  ;;  %2666 = vmatmul.mubr.msk.f32.vlgmr.msra.gmra.mrb[8].mxu1 %vm1408_vm4, %v4800_v34 }
 0x501   :  { %3321 = vmatpush1.bf16.msra.mxu0 %v3951_v16  ;;  %3353 = vmatpush1.bf16.msra.mxu1 %v3953_v17 }
 0x502   :  { %3323 = vmatprep.subr.bf16.mxu0 %v3956_v21  ;;  %3355 = vmatprep.subr.bf16.mxu1 %v3960_v25 }
 0x503   :  { %1780 = vmatprep.mubr.f32.mxu0 %v4789_v5  ;;  %1851 = vmatprep.mubr.f32.mxu1 %v4789_v5 }
 0x505   :  { %3325 = vmatpush1.bf16.msra.mxu0 %v3962_v26  ;;  %3357 = vmatpush1.bf16.msra.mxu1 %v3965_v30 }
 0x506   :  { %3327 = vmatprep.subr.bf16.mxu0 %v3971_v35  ;;  %3359 = vmatprep.subr.bf16.mxu1 %v3973_v36 }
 0x509   :  { %3329 = vmatpush1.bf16.msra.mxu0 %v3977_v43  ;;  %3361 = vmatpush1.bf16.msra.mxu1 %v3979_v44 }
 0x50a   :  { %3331 = vmatprep.subr.bf16.mxu0 %v3983_v48  ;;  %3363 = vmatprep.subr.bf16.mxu1 %v3985_v49 }
 0x50d   :  { %3333 = vmatpush1.bf16.msra.mxu0 %v4850_v61  ;;  %3365 = vmatpush1.bf16.msra.mxu1 %v4851_v12 }
 0x50e   :  { %3335 = vmatprep.subr.bf16.mxu0 %v4852_v23  ;;  %3367 = vmatprep.subr.bf16.mxu1 %v4853_v41 }
 0x511   :  { %3337 = vmatpush1.bf16.msra.mxu0 %v4854_v45  ;;  %3369 = vmatpush1.bf16.msra.mxu1 %v4855_v9  ;;  %v4866_v9 = vld [vmem:[#allocation25_spill] sm:$0xff] }
 0x512   :  { %3339 = vmatprep.subr.bf16.mxu0 %v4856_v24  ;;  %3371 = vmatprep.subr.bf16.mxu1 %v4857_v6  ;;  %v4867_v24 = vld [vmem:[#allocation26_spill] sm:$0xff]  ;;  %v4868_v6 = vld [vmem:[#allocation27_spill] sm:$0xff] }
 0x515   :  { %3341 = vmatpush1.bf16.msra.mxu0 %v4858_v37  ;;  %3373 = vmatpush1.bf16.msra.mxu1 %v4859_v3  ;;  %v4869_v37 = vld [vmem:[#allocation28_spill] sm:$0xff] }
 0x516   :  { %3343 = vmatprep.subr.bf16.mxu0 %v4860_v13  ;;  %3375 = vmatprep.subr.bf16.mxu1 %v4861_v58 }
 0x519   :  { %3345 = vmatpush1.bf16.msra.mxu0 %v4862_v38  ;;  %3377 = vmatpush1.bf16.msra.mxu1 %v4863_v57 }
 0x51a   :  { %3347 = vmatprep.subr.bf16.mxu0 %v4864_v29  ;;  %3379 = vmatprep.subr.bf16.mxu1 %v4865_v62 }
 0x51d   :  { %3349 = vmatpush1.bf16.msra.mxu0 %v4866_v9  ;;  %3381 = vmatpush1.bf16.msra.mxu1 %v4867_v24 }
 0x51e   :  { %3383 = vmatprep.subr.bf16.mxu0 %v4868_v6  ;;  %3415 = vmatprep.subr.bf16.mxu1 %v4869_v37 }
 0x5d3   :  { %v1618_v3 = vpop.f32.mrb[8].mxu0  ;;  %v1689_v13 = vpop.f32.mrb[8].mxu1 }
 0x5d4   :  { %3783 = vtanh.f32 %v1618_v3  ;;  %v1620_v58 = vpop.f32.mrb[9].mxu0  ;;  %v1691_v45 = vpop.f32.mrb[9].mxu1 }
 0x5d5   :  { %3785 = vtanh.f32 %v1620_v58 }
 0x5d6   :  { %3787 = vtanh.f32 %v1691_v45 }
 0x5d7   :  { %3789 = vtanh.f32 %v1689_v13  ;;  %v4877_v13 = vld [vmem:[#allocation16_spill] sm:$0xff] }
 0x5de   :  { %v3784_v57 = vpop.eup %3783 }
 0x5df   :  { %v1697_v38 = vadd.f32 1.0, %v3784_v57  ;;  %v3786_v29 = vpop.eup %3785  ;;  %v4879_v57 = vld [vmem:[#allocation18_spill] sm:$0xff] }
 0x5e0   :  { %v1698_v62 = vadd.f32 1.0, %v3786_v29  ;;  %v3788_v9 = vpop.eup %3787  ;;  %v4880_v29 = vld [vmem:[#allocation19_spill] sm:$0xff] }
 0x5e1   :  { %v1700_v41 = vmul.f32 0.5, %v1697_v38  ;;  %v3790_v3 = vpop.eup %3789  ;;  %v4878_v38 = vld [vmem:[#allocation17_spill] sm:$0xff] }
 0x5e2   :  { %v1701_v23 = vmul.f32 0.5, %v1698_v62  ;;  %v1699_v37 = vadd.f32 1.0, %v3790_v3  ;;  %v4881_v62 = vld [vmem:[#allocation20_spill] sm:$0xff]  ;;  %v4882_v3 = vld [vmem:[#allocation21_spill] sm:$0xff] }
 0x5e3   :  { %v1705_v24 = vmul.f32 %v3788_v9, %v1700_v41  ;;  %v4872_v41 = vld [vmem:[#allocation11_spill] sm:$0xff]  ;;  %v4873_v9 = vld [vmem:[#allocation12_spill] sm:$0xff] }
 0x5e4   :  { %v1704_v6 = vmul.f32 %v1701_v23, %v4423_v8  ;;  %v1702_v61 = vmul.f32 0.5, %v1699_v37  ;;  %v1713_v8 = vpop.permute.xlu1 %1712  ;;  %v4871_v23 = vld [vmem:[#allocation10_spill] sm:$0xff]  ;;  %v4876_v37 = vld [vmem:[#allocation15_spill] sm:$0xff] }
 0x5e5   :  { %vm1714_vm5 = vcmp.eq.s32.totalorder %v1713_v8, %v4147_v55  ;;  %v4885_v8 = vld [vmem:[#allocation24_spill] sm:$0xff] }
 0x5e6   :  { %v4498_v12 = vadd.f32 %v1705_v24, %v1704_v6  ;;  %v4874_v24 = vld [vmem:[#allocation13_spill] sm:$0xff]  ;;  %v4875_v6 = vld [vmem:[#allocation14_spill] sm:$0xff] }
 0x5e8   :  { %3791 = vtanh.f32 %v4498_v12 }
 0x5f2   :  { %v3792_v58 = vpop.eup %3791 }
 0x5f3   :  { %v1708_v45 = vmul.f32 %v3792_v58, %v1702_v61  ;;  %v4870_v61 = vld [vmem:[#allocation9_spill] sm:$0xff]  ;;  %v4883_v58 = vld [vmem:[#allocation22_spill] sm:$0xff] }
 0x5f5   :  { %1781 = vmatmul.mubr.f32.vlgmr.msra.gmra.mrb[10].mxu0 %v1708_v45  ;;  %1852 = vmatmul.mubr.f32.vlgmr.msra.gmra.mrb[10].mxu1 %v1708_v45  ;;  %v4884_v45 = vld [vmem:[#allocation23_spill] sm:$0xff] }
 0x5f6   :  { %3385 = vmatpush1.bf16.msra.mxu0 %v4049_v15  ;;  %3417 = vmatpush1.bf16.msra.mxu1 %v4051_v18 }
 0x5f7   :  { %3387 = vmatprep.subr.bf16.mxu0 %v4055_v22  ;;  %3419 = vmatprep.subr.bf16.mxu1 %v4057_v27 }
 0x5f8   :  { %1922 = vmatprep.mubr.f32.mxu0 %v4789_v5  ;;  %1993 = vmatprep.mubr.f32.mxu1 %v4789_v5 }
 0x5fa   :  { %3389 = vmatpush1.bf16.msra.mxu0 %v4063_v39  ;;  %3421 = vmatpush1.bf16.msra.mxu1 %v4065_v42 }
 0x5fb   :  { %3391 = vmatprep.subr.bf16.mxu0 %v4069_v51  ;;  %3423 = vmatprep.subr.bf16.mxu1 %v4071_v52 }
 0x5fe   :  { %3393 = vmatpush1.bf16.msra.mxu0 %v4790_v31  ;;  %3425 = vmatpush1.bf16.msra.mxu1 %v4791_v40 }
 0x5ff   :  { %3395 = vmatprep.subr.bf16.mxu0 %v4792_v46  ;;  %3427 = vmatprep.subr.bf16.mxu1 %v4793_v47 }
 0x602   :  { %3397 = vmatpush1.bf16.msra.mxu0 %v4794_v56  ;;  %3429 = vmatpush1.bf16.msra.mxu1 %v4795_v59 }
 0x603   :  { %3399 = vmatprep.subr.bf16.mxu0 %v4796_v0  ;;  %3431 = vmatprep.subr.bf16.mxu1 %v4797_v1 }
 0x606   :  { %3401 = vmatpush1.bf16.msra.mxu0 %v4798_v10  ;;  %3433 = vmatpush1.bf16.msra.mxu1 %v4799_v54 }
 0x607   :  { %3403 = vmatprep.subr.bf16.mxu0 %v4107_v32  ;;  %3435 = vmatprep.subr.bf16.mxu1 %v4109_v33 }
 0x60a   :  { %3405 = vmatpush1.bf16.msra.mxu0 %v4113_v50  ;;  %3437 = vmatpush1.bf16.msra.mxu1 %v4115_v53 }
 0x60b   :  { %3407 = vmatprep.subr.bf16.mxu0 %v4119_v2  ;;  %3439 = vmatprep.subr.bf16.mxu1 %v4121_v4 }
 0x60e   :  { %3409 = vmatpush1.bf16.msra.mxu0 %v4125_v20  ;;  %3441 = vmatpush1.bf16.msra.mxu1 %v4127_v28 }
 0x60f   :  { %3411 = vmatprep.subr.bf16.mxu0 %v4131_v14  ;;  %3443 = vmatprep.subr.bf16.mxu1 %v4133_v19 }
 0x612   :  { %3413 = vmatpush1.bf16.msra.mxu0 %v4137_v60  ;;  %3445 = vmatpush1.bf16.msra.mxu1 %v4139_v63 }
 0x613   :  { %3447 = vmatprep.subr.bf16.mxu0 %v3943_v7  ;;  %3479 = vmatprep.subr.bf16.mxu1 %v3945_v11 }
 0x615   :  { %2668 = vmatmul.mubr.msk.f32.vlgmr.msra.gmra.mrb[10].mxu0 %vm1714_vm5, %v4800_v34  ;;  %2669 = vmatmul.mubr.msk.f32.vlgmr.msra.gmra.mrb[10].mxu1 %vm1714_vm5, %v4800_v34 }
 0x616   :  { %3449 = vmatpush1.bf16.msra.mxu0 %v3951_v16  ;;  %3481 = vmatpush1.bf16.msra.mxu1 %v3953_v17 }
 0x617   :  { %3451 = vmatprep.subr.bf16.mxu0 %v3956_v21  ;;  %3483 = vmatprep.subr.bf16.mxu1 %v3960_v25 }
 0x618   :  { %2086 = vmatprep.mubr.f32.mxu0 %v4789_v5  ;;  %2157 = vmatprep.mubr.f32.mxu1 %v4789_v5 }
 0x61a   :  { %3453 = vmatpush1.bf16.msra.mxu0 %v3962_v26  ;;  %3485 = vmatpush1.bf16.msra.mxu1 %v3965_v30 }
 0x61b   :  { %3455 = vmatprep.subr.bf16.mxu0 %v3971_v35  ;;  %3487 = vmatprep.subr.bf16.mxu1 %v3973_v36 }
 0x61e   :  { %3457 = vmatpush1.bf16.msra.mxu0 %v3977_v43  ;;  %3489 = vmatpush1.bf16.msra.mxu1 %v3979_v44 }
 0x61f   :  { %3459 = vmatprep.subr.bf16.mxu0 %v3983_v48  ;;  %3491 = vmatprep.subr.bf16.mxu1 %v3985_v49 }
 0x622   :  { %3461 = vmatpush1.bf16.msra.mxu0 %v4870_v61  ;;  %3493 = vmatpush1.bf16.msra.mxu1 %v4871_v23 }
 0x623   :  { %3463 = vmatprep.subr.bf16.mxu0 %v4872_v41  ;;  %3495 = vmatprep.subr.bf16.mxu1 %v4873_v9 }
 0x626   :  { %3465 = vmatpush1.bf16.msra.mxu0 %v4874_v24  ;;  %3497 = vmatpush1.bf16.msra.mxu1 %v4875_v6  ;;  %v4886_v6 = vld [vmem:[#allocation25_spill] sm:$0xff] }
 0x627   :  { %3467 = vmatprep.subr.bf16.mxu0 %v4876_v37  ;;  %3499 = vmatprep.subr.bf16.mxu1 %v4877_v13  ;;  %v4887_v37 = vld [vmem:[#allocation26_spill] sm:$0xff]  ;;  %v4888_v13 = vld [vmem:[#allocation27_spill] sm:$0xff] }
 0x62a   :  { %3469 = vmatpush1.bf16.msra.mxu0 %v4878_v38  ;;  %3501 = vmatpush1.bf16.msra.mxu1 %v4879_v57  ;;  %v4889_v38 = vld [vmem:[#allocation28_spill] sm:$0xff] }
 0x62b   :  { %3471 = vmatprep.subr.bf16.mxu0 %v4880_v29  ;;  %3503 = vmatprep.subr.bf16.mxu1 %v4881_v62 }
 0x62e   :  { %3473 = vmatpush1.bf16.msra.mxu0 %v4882_v3  ;;  %3505 = vmatpush1.bf16.msra.mxu1 %v4883_v58 }
 0x62f   :  { %3475 = vmatprep.subr.bf16.mxu0 %v4884_v45  ;;  %3507 = vmatprep.subr.bf16.mxu1 %v4885_v8 }
 0x632   :  { %3477 = vmatpush1.bf16.msra.mxu0 %v4886_v6  ;;  %3509 = vmatpush1.bf16.msra.mxu1 %v4887_v37 }
 0x633   :  { %3511 = vmatprep.subr.bf16.mxu0 %v4888_v13  ;;  %3543 = vmatprep.subr.bf16.mxu1 %v4889_v38 }
 0x6e8   :  { %v1924_v57 = vpop.f32.mrb[10].mxu0  ;;  %v1995_v29 = vpop.f32.mrb[10].mxu1 }
 0x6e9   :  { %3793 = vtanh.f32 %v1924_v57  ;;  %v1926_v62 = vpop.f32.mrb[11].mxu0  ;;  %v1997_v24 = vpop.f32.mrb[11].mxu1 }
 0x6ea   :  { %3795 = vtanh.f32 %v1926_v62 }
 0x6eb   :  { %3797 = vtanh.f32 %v1997_v24 }
 0x6ec   :  { %3799 = vtanh.f32 %v1995_v29 }
 0x6f3   :  { %v3794_v58 = vpop.eup %3793 }
 0x6f4   :  { %v2003_v3 = vadd.f32 1.0, %v3794_v58  ;;  %v3796_v45 = vpop.eup %3795 }
 0x6f5   :  { %v2004_v8 = vadd.f32 1.0, %v3796_v45  ;;  %v3798_v6 = vpop.eup %3797 }
 0x6f6   :  { %v2006_v9 = vmul.f32 0.5, %v2003_v3  ;;  %v3800_v57 = vpop.eup %3799 }
 0x6f7   :  { %v2007_v41 = vmul.f32 0.5, %v2004_v8  ;;  %v2005_v38 = vadd.f32 1.0, %v3800_v57 }
 0x6f8   :  { %v2011_v37 = vmul.f32 %v3798_v6, %v2006_v9  ;;  %v4906_v9 = vld [vmem:[#allocation25_spill] sm:$0xff]  ;;  %v4907_v6 = vld [vmem:[#allocation26_spill] sm:$0xff] }
 0x6f9   :  { %v2010_v13 = vmul.f32 %v2007_v41, %v4498_v12  ;;  %v2008_v61 = vmul.f32 0.5, %v2005_v38  ;;  %v2019_v12 = vpop.permute.xlu0 %2018  ;;  %v4905_v41 = vld [vmem:[#allocation24_spill] sm:$0xff] }
 0x6fa   :  { %vm2020_vm6 = vcmp.eq.s32.totalorder %v2019_v12, %v4147_v55 }
 0x6fb   :  { %v4573_v23 = vadd.f32 %v2011_v37, %v2010_v13  ;;  %v4908_v37 = vld [vmem:[#allocation27_spill] sm:$0xff]  ;;  %v4909_v13 = vld [vmem:[#allocation28_spill] sm:$0xff] }
 0x6fd   :  { %3801 = vtanh.f32 %v4573_v23 }
 0x707   :  { %v3802_v62 = vpop.eup %3801 }
 0x708   :  { %v2014_v24 = vmul.f32 %v3802_v62, %v2008_v61  ;;  %v4904_v61 = vld [vmem:[#allocation23_spill] sm:$0xff] }
 0x70a   :  { %2087 = vmatmul.mubr.f32.vlgmr.msra.gmra.mrb[12].mxu0 %v2014_v24  ;;  %2158 = vmatmul.mubr.f32.vlgmr.msra.gmra.mrb[12].mxu1 %v2014_v24 }
 0x70b   :  { %3513 = vmatpush1.bf16.msra.mxu0 %v4049_v15  ;;  %3545 = vmatpush1.bf16.msra.mxu1 %v4051_v18 }
 0x70c   :  { %3515 = vmatprep.subr.bf16.mxu0 %v4055_v22  ;;  %3547 = vmatprep.subr.bf16.mxu1 %v4057_v27 }
 0x70d   :  { %2228 = vmatprep.mubr.f32.mxu0 %v4789_v5  ;;  %2299 = vmatprep.mubr.f32.mxu1 %v4789_v5 }
 0x70f   :  { %3517 = vmatpush1.bf16.msra.mxu0 %v4063_v39  ;;  %3549 = vmatpush1.bf16.msra.mxu1 %v4065_v42 }
 0x710   :  { %3519 = vmatprep.subr.bf16.mxu0 %v4069_v51  ;;  %3551 = vmatprep.subr.bf16.mxu1 %v4071_v52 }
 0x713   :  { %3521 = vmatpush1.bf16.msra.mxu0 %v4790_v31  ;;  %3553 = vmatpush1.bf16.msra.mxu1 %v4791_v40 }
 0x714   :  { %3523 = vmatprep.subr.bf16.mxu0 %v4792_v46  ;;  %3555 = vmatprep.subr.bf16.mxu1 %v4793_v47 }
 0x717   :  { %3525 = vmatpush1.bf16.msra.mxu0 %v4794_v56  ;;  %3557 = vmatpush1.bf16.msra.mxu1 %v4795_v59 }
 0x718   :  { %3527 = vmatprep.subr.bf16.mxu0 %v4796_v0  ;;  %3559 = vmatprep.subr.bf16.mxu1 %v4797_v1 }
 0x71b   :  { %3529 = vmatpush1.bf16.msra.mxu0 %v4798_v10  ;;  %3561 = vmatpush1.bf16.msra.mxu1 %v4799_v54 }
 0x71c   :  { %3531 = vmatprep.subr.bf16.mxu0 %v4107_v32  ;;  %3563 = vmatprep.subr.bf16.mxu1 %v4109_v33 }
 0x71f   :  { %3533 = vmatpush1.bf16.msra.mxu0 %v4113_v50  ;;  %3565 = vmatpush1.bf16.msra.mxu1 %v4115_v53 }
 0x720   :  { %3535 = vmatprep.subr.bf16.mxu0 %v4119_v2  ;;  %3567 = vmatprep.subr.bf16.mxu1 %v4121_v4 }
 0x723   :  { %3537 = vmatpush1.bf16.msra.mxu0 %v4125_v20  ;;  %3569 = vmatpush1.bf16.msra.mxu1 %v4127_v28 }
 0x724   :  { %3539 = vmatprep.subr.bf16.mxu0 %v4131_v14  ;;  %3571 = vmatprep.subr.bf16.mxu1 %v4133_v19 }
 0x727   :  { %3541 = vmatpush1.bf16.msra.mxu0 %v4137_v60  ;;  %3573 = vmatpush1.bf16.msra.mxu1 %v4139_v63 }
 0x728   :  { %3575 = vmatprep.subr.bf16.mxu0 %v3943_v7  ;;  %3607 = vmatprep.subr.bf16.mxu1 %v3945_v11  ;;  %v4890_v7 = vld [vmem:[#allocation9_spill] sm:$0xff]  ;;  %v4891_v11 = vld [vmem:[#allocation10_spill] sm:$0xff] }
 0x72a   :  { %2671 = vmatmul.mubr.msk.f32.vlgmr.msra.gmra.mrb[12].mxu0 %vm2020_vm6, %v4800_v34  ;;  %2672 = vmatmul.mubr.msk.f32.vlgmr.msra.gmra.mrb[12].mxu1 %vm2020_vm6, %v4800_v34 }
 0x72b   :  { %3577 = vmatpush1.bf16.msra.mxu0 %v3951_v16  ;;  %3609 = vmatpush1.bf16.msra.mxu1 %v3953_v17  ;;  %v4892_v16 = vld [vmem:[#allocation11_spill] sm:$0xff]  ;;  %v4893_v17 = vld [vmem:[#allocation12_spill] sm:$0xff] }
 0x72c   :  { %3579 = vmatprep.subr.bf16.mxu0 %v3956_v21  ;;  %3611 = vmatprep.subr.bf16.mxu1 %v3960_v25  ;;  %v4894_v21 = vld [vmem:[#allocation13_spill] sm:$0xff]  ;;  %v4895_v25 = vld [vmem:[#allocation14_spill] sm:$0xff] }
 0x72d   :  { %2392 = vmatprep.mubr.f32.mxu0 %v4789_v5  ;;  %2463 = vmatprep.mubr.f32.mxu1 %v4789_v5 }
 0x72f   :  { %3581 = vmatpush1.bf16.msra.mxu0 %v3962_v26  ;;  %3613 = vmatpush1.bf16.msra.mxu1 %v3965_v30  ;;  %v4896_v26 = vld [vmem:[#allocation15_spill] sm:$0xff]  ;;  %v4897_v30 = vld [vmem:[#allocation16_spill] sm:$0xff] }
 0x730   :  { %3583 = vmatprep.subr.bf16.mxu0 %v3971_v35  ;;  %3615 = vmatprep.subr.bf16.mxu1 %v3973_v36  ;;  %v4898_v35 = vld [vmem:[#allocation17_spill] sm:$0xff]  ;;  %v4899_v36 = vld [vmem:[#allocation18_spill] sm:$0xff] }
 0x733   :  { %3585 = vmatpush1.bf16.msra.mxu0 %v3977_v43  ;;  %3617 = vmatpush1.bf16.msra.mxu1 %v3979_v44  ;;  %v4900_v43 = vld [vmem:[#allocation19_spill] sm:$0xff]  ;;  %v4901_v44 = vld [vmem:[#allocation20_spill] sm:$0xff] }
 0x734   :  { %3587 = vmatprep.subr.bf16.mxu0 %v3983_v48  ;;  %3619 = vmatprep.subr.bf16.mxu1 %v3985_v49  ;;  %v4902_v48 = vld [vmem:[#allocation21_spill] sm:$0xff]  ;;  %v4903_v49 = vld [vmem:[#allocation22_spill] sm:$0xff] }
 0x737   :  { %3589 = vmatpush1.bf16.msra.mxu0 %v4890_v7  ;;  %3621 = vmatpush1.bf16.msra.mxu1 %v4891_v11 }
 0x738   :  { %3591 = vmatprep.subr.bf16.mxu0 %v4892_v16  ;;  %3623 = vmatprep.subr.bf16.mxu1 %v4893_v17 }
 0x73b   :  { %3593 = vmatpush1.bf16.msra.mxu0 %v4894_v21  ;;  %3625 = vmatpush1.bf16.msra.mxu1 %v4895_v25 }
 0x73c   :  { %3595 = vmatprep.subr.bf16.mxu0 %v4896_v26  ;;  %3627 = vmatprep.subr.bf16.mxu1 %v4897_v30 }
 0x73f   :  { %3597 = vmatpush1.bf16.msra.mxu0 %v4898_v35  ;;  %3629 = vmatpush1.bf16.msra.mxu1 %v4899_v36 }
 0x740   :  { %3599 = vmatprep.subr.bf16.mxu0 %v4900_v43  ;;  %3631 = vmatprep.subr.bf16.mxu1 %v4901_v44 }
 0x743   :  { %3601 = vmatpush1.bf16.msra.mxu0 %v4902_v48  ;;  %3633 = vmatpush1.bf16.msra.mxu1 %v4903_v49 }
 0x744   :  { %3603 = vmatprep.subr.bf16.mxu0 %v4904_v61  ;;  %3635 = vmatprep.subr.bf16.mxu1 %v4905_v41 }
 0x747   :  { %3605 = vmatpush1.bf16.msra.mxu0 %v4906_v9  ;;  %3637 = vmatpush1.bf16.msra.mxu1 %v4907_v6 }
 0x748   :  { %3639 = vmatprep.subr.bf16.mxu0 %v4908_v37  ;;  %3671 = vmatprep.subr.bf16.mxu1 %v4909_v13 }
 0x7fd   :  { %v2230_v38 = vpop.f32.mrb[12].mxu0  ;;  %v2301_v29 = vpop.f32.mrb[12].mxu1 }
 0x7fe   :  { %3803 = vtanh.f32 %v2230_v38  ;;  %v2232_v3 = vpop.f32.mrb[13].mxu0  ;;  %v2303_v58 = vpop.f32.mrb[13].mxu1 }
 0x7ff   :  { %3805 = vtanh.f32 %v2232_v3 }
 0x800   :  { %3807 = vtanh.f32 %v2303_v58 }
 0x801   :  { %3809 = vtanh.f32 %v2301_v29 }
 0x808   :  { %v3804_v45 = vpop.eup %3803 }
 0x809   :  { %v2309_v8 = vadd.f32 1.0, %v3804_v45  ;;  %v3806_v57 = vpop.eup %3805 }
 0x80a   :  { %v2310_v24 = vadd.f32 1.0, %v3806_v57  ;;  %v3808_v12 = vpop.eup %3807 }
 0x80b   :  { %v2312_v62 = vmul.f32 0.5, %v2309_v8  ;;  %v3810_v21 = vpop.eup %3809 }
 0x80c   :  { %v2313_v7 = vmul.f32 0.5, %v2310_v24  ;;  %v2311_v25 = vadd.f32 1.0, %v3810_v21 }
 0x80d   :  { %v2317_v11 = vmul.f32 %v3808_v12, %v2312_v62 }
 0x80e   :  { %v2316_v16 = vmul.f32 %v2313_v7, %v4573_v23  ;;  %v2314_v26 = vmul.f32 0.5, %v2311_v25 }
 0x810   :  { %v2318_v17 = vadd.f32 %v2317_v11, %v2316_v16 }
 0x812   :  { %3811 = vtanh.f32 %v2318_v17 }
 0x81c   :  { %v3812_v30 = vpop.eup %3811 }
 0x81d   :  { %v2320_v35 = vmul.f32 %v3812_v30, %v2314_v26 }
 0x81f   :  { %2393 = vmatmul.mubr.f32.vlgmr.msra.gmra.mrb[14].mxu0 %v2320_v35  ;;  %2464 = vmatmul.mubr.f32.vlgmr.msra.gmra.mrb[14].mxu1 %v2320_v35 }
 0x820   :  { %3641 = vmatpush1.bf16.msra.mxu0 %v4049_v15  ;;  %3673 = vmatpush1.bf16.msra.mxu1 %v4051_v18  ;;  %v2325_v15 = vpop.permute.xlu1 %2324 }
 0x821   :  { %3643 = vmatprep.subr.bf16.mxu0 %v4055_v22  ;;  %3675 = vmatprep.subr.bf16.mxu1 %v4057_v27  ;;  %vm2326_vm7 = vcmp.eq.s32.totalorder %v2325_v15, %v4147_v55 }
 0x822   :  { %2534 = vmatprep.mubr.f32.mxu0 %v4789_v5  ;;  %2605 = vmatprep.mubr.f32.mxu1 %v4789_v5 }
 0x824   :  { %3645 = vmatpush1.bf16.msra.mxu0 %v4063_v39  ;;  %3677 = vmatpush1.bf16.msra.mxu1 %v4065_v42 }
 0x825   :  { %3647 = vmatprep.subr.bf16.mxu0 %v4069_v51  ;;  %3679 = vmatprep.subr.bf16.mxu1 %v4071_v52 }
 0x828   :  { %3649 = vmatpush1.bf16.msra.mxu0 %v4790_v31  ;;  %3681 = vmatpush1.bf16.msra.mxu1 %v4791_v40  ;;  %v2677_v31 = vld [vmem:[#allocation2] ss:$0 sm:$0xff] }
 0x829   :  { %3651 = vmatprep.subr.bf16.mxu0 %v4792_v46  ;;  %3683 = vmatprep.subr.bf16.mxu1 %v4793_v47 }
 0x82c   :  { %3653 = vmatpush1.bf16.msra.mxu0 %v4794_v56  ;;  %3685 = vmatpush1.bf16.msra.mxu1 %v4795_v59 }
 0x82d   :  { %3655 = vmatprep.subr.bf16.mxu0 %v4796_v0  ;;  %3687 = vmatprep.subr.bf16.mxu1 %v4797_v1 }
 0x830   :  { %3657 = vmatpush1.bf16.msra.mxu0 %v4798_v10  ;;  %3689 = vmatpush1.bf16.msra.mxu1 %v4799_v54 }
 0x831   :  { %3659 = vmatprep.subr.bf16.mxu0 %v4107_v32  ;;  %3691 = vmatprep.subr.bf16.mxu1 %v4109_v33 }
 0x834   :  { %3661 = vmatpush1.bf16.msra.mxu0 %v4113_v50  ;;  %3693 = vmatpush1.bf16.msra.mxu1 %v4115_v53 }
 0x835   :  { %3663 = vmatprep.subr.bf16.mxu0 %v4119_v2  ;;  %3695 = vmatprep.subr.bf16.mxu1 %v4121_v4 }
 0x838   :  { %3665 = vmatpush1.bf16.msra.mxu0 %v4125_v20  ;;  %3697 = vmatpush1.bf16.msra.mxu1 %v4127_v28 }
 0x839   :  { %3667 = vmatprep.subr.bf16.mxu0 %v4131_v14  ;;  %3699 = vmatprep.subr.bf16.mxu1 %v4133_v19 }
 0x83c   :  { %3669 = vmatpush1.bf16.msra.mxu0 %v4137_v60  ;;  %3701 = vmatpush1.bf16.msra.mxu1 %v4139_v63  ;;  %v2676_v63 = vld [vmem:[%s4692_s3] ss:$0 sm:$0xff] }
 0x83f   :  { %2674 = vmatmul.mubr.msk.f32.vlgmr.msra.gmra.mrb[14].mxu0 %vm2326_vm7, %v4800_v34  ;;  %2675 = vmatmul.mubr.msk.f32.vlgmr.msra.gmra.mrb[14].mxu1 %vm2326_vm7, %v4800_v34 }
 0x912   :  { %v2536_v18 = vpop.f32.mrb[14].mxu0  ;;  %v2607_v22 = vpop.f32.mrb[14].mxu1 }
 0x913   :  { %3813 = vtanh.f32 %v2536_v18  ;;  %v2538_v27 = vpop.f32.mrb[15].mxu0  ;;  %v2609_v39 = vpop.f32.mrb[15].mxu1 }
 0x914   :  { %3815 = vtanh.f32 %v2538_v27 }
 0x915   :  { %3817 = vtanh.f32 %v2609_v39 }
 0x916   :  { %3819 = vtanh.f32 %v2607_v22 }
 0x91d   :  { %v3814_v42 = vpop.eup %3813 }
 0x91e   :  { %v2615_v51 = vadd.f32 1.0, %v3814_v42  ;;  %v3816_v52 = vpop.eup %3815 }
 0x91f   :  { %v2616_v33 = vadd.f32 1.0, %v3816_v52  ;;  %v3818_v50 = vpop.eup %3817 }
 0x920   :  { %v2618_v32 = vmul.f32 0.5, %v2615_v51  ;;  %v3820_v28 = vpop.eup %3819 }
 0x921   :  { %v2619_v53 = vmul.f32 0.5, %v2616_v33  ;;  %v2617_v14 = vadd.f32 1.0, %v3820_v28 }
 0x922   :  { %v2623_v2 = vmul.f32 %v3818_v50, %v2618_v32 }
 0x923   :  { %v2622_v4 = vmul.f32 %v2619_v53, %v2318_v17  ;;  %v2620_v19 = vmul.f32 0.5, %v2617_v14 }
 0x925   :  { %v2624_v20 = vadd.f32 %v2623_v2, %v2622_v4 }
 0x927   :  { %3821 = vtanh.f32 %v2624_v20 }
 0x931   :  { %v3822_v60 = vpop.eup %3821 }
 0x932   :  { %v2626_v55 = vmul.f32 %v3822_v60, %v2620_v19 }
 0x934   :  { %v2634_v5 = vmul.f32 %v2676_v63, %v2626_v55 }
 0x936   :  { %2635 = vadd.xlane.f32.xlu0 %v2634_v5 }
 0x9c3   :  { %v2636_v40 = vpop.xlane.xlu0 %2635 }
 0x9c4   :  { %v2644_v46 = vadd.f32 %v2677_v31, %v2636_v40 }
 0x9c6   :  { %2646 = vst.msk [vmem:[%s4694_s5] sm:$0xff] %vm2645_vm8, %v2644_v46 }
 0x9c7   :  { %2651 = vsyncpa [#allocation4], 1 }
 0x9c8   :  { %2652 = vsyncpa [#allocation6], 1 }

</bundles_post_ra>
